<compile_context>
chip_gen: v5e
topology: v5e:2x2
jax: 0.10.0
libtpu: 0.0.40
codegen_flags: <defaults>
</compile_context>

<pallas_src>
import functools

import jax
import jax.numpy as jnp
from jax import lax
from jax.experimental import pallas as pl
from jax.experimental.pallas import tpu as pltpu

ROW_TILE_CAP = 512                 # v7x-safe row tile for the generic matmul
VMEM_LIMIT_BYTES = 32 * 1024 * 1024  # raise v5e's 16 MiB scoped default


def _cparams():
    return pltpu.CompilerParams(
        dimension_semantics=("parallel",),
        vmem_limit_bytes=VMEM_LIMIT_BYTES,
    )


def _cost(flops, bytes_accessed):
    return pl.CostEstimate(flops=int(flops), transcendentals=0,
                           bytes_accessed=int(bytes_accessed))


# ----------------------------------------------------------------------------
# Encoder kernel: depthwise 3x3 s2 + pointwise 1x1 + bias + ReLU, fused.
# Input block: [1, Ho+1, 2, Wo+1, 2*Cin]  (padded input, h/w phase-split)
# Weights: wa/wb [3, 2*Cin, Cout]  (per-kh column groups; wb's upper half = 0)
# Output block: [1, Ho*Wo, Cout]
# ----------------------------------------------------------------------------
def _enc_kernel(x_ref, wa_ref, wb_ref, b_ref, o_ref, *, Ho, Wo, cin):
    cout = wa_ref.shape[-1]
    acc = jnp.zeros((Ho * Wo, cout), jnp.float32)
    for kh in range(3):
        hp, hoff = kh % 2, kh // 2
        # taps (kh, kw=0/1): padded cols 2w / 2w+1
        xa = x_ref[0, hoff:hoff + Ho, hp, 0:Wo, :].reshape(Ho * Wo, 2 * cin)
        # tap (kh, kw=2): padded col 2w+2 (lanes [0:cin]; wb rows [cin:] are 0)
        xb = x_ref[0, hoff:hoff + Ho, hp, 1:Wo + 1, :].reshape(Ho * Wo, 2 * cin)
        acc = acc + jnp.dot(xa, wa_ref[kh], preferred_element_type=jnp.float32)
        acc = acc + jnp.dot(xb, wb_ref[kh], preferred_element_type=jnp.float32)
    acc = acc + b_ref[...].astype(jnp.float32)
    acc = jnp.maximum(acc, 0.0)
    o_ref[0] = acc.astype(o_ref.dtype)


def encoder_block(x_nhwc, wa, wb, b, *, compute_dtype, out_dtype):
    N, H, W, cin = x_nhwc.shape
    Ho = (H - 1) // 2 + 1
    Wo = (W - 1) // 2 + 1
    Hp, Wp = 2 * Ho + 2, 2 * Wo + 2
    # single cheap pad pass (bf16), then a *free* contiguous reshape
    xp = jnp.pad(x_nhwc.astype(compute_dtype),
                 ((0, 0), (1, Hp - H - 1), (1, Wp - W - 1), (0, 0)))
    xr = xp.reshape(N, Ho + 1, 2, Wo + 1, 2 * cin)
    cout = wa.shape[-1]
    itemsize = jnp.dtype(compute_dtype).itemsize
    flops = 2 * N * Ho * Wo * (12 * cin) * cout
    bytes_acc = (xr.size * itemsize + (wa.size + wb.size) * itemsize
                 + N * Ho * Wo * cout * jnp.dtype(out_dtype).itemsize)
    out = pl.pallas_call(
        functools.partial(_enc_kernel, Ho=Ho, Wo=Wo, cin=cin),
        out_shape=jax.ShapeDtypeStruct((N, Ho * Wo, cout), out_dtype),
        grid=(N,),
        in_specs=[
            pl.BlockSpec((1, Ho + 1, 2, Wo + 1, 2 * cin),
                         lambda n: (n, 0, 0, 0, 0)),
            pl.BlockSpec((3, 2 * cin, cout), lambda n: (0, 0, 0)),
            pl.BlockSpec((3, 2 * cin, cout), lambda n: (0, 0, 0)),
            pl.BlockSpec((1, cout), lambda n: (0, 0)),
        ],
        out_specs=pl.BlockSpec((1, Ho * Wo, cout), lambda n: (n, 0, 0)),
        compiler_params=_cparams(),
        cost_estimate=_cost(flops, bytes_acc),
    )(xr, wa, wb, b)
    return out.reshape(N, Ho, Wo, cout)


# ----------------------------------------------------------------------------
# Decoder kernel: (x [+ skip]) -> depthwise 2x2 s2 deconv + pw 1x1 + ReLU,
# output written directly in interleaved layout [1, Hd, 2, Wd, 2*Cout].
# ----------------------------------------------------------------------------
def _dec_body(x, w_ref, b_ref, o_ref, Hd, Wd):
    for hp in range(2):
        acc = jnp.dot(x, w_ref[hp], preferred_element_type=jnp.float32)
        acc = acc + b_ref[hp].astype(jnp.float32)
        acc = jnp.maximum(acc, 0.0)
        o_ref[0, :, hp, :, :] = acc.reshape(Hd, Wd, -1).astype(o_ref.dtype)


def _dec_kernel(x_ref, w_ref, b_ref, o_ref, *, Hd, Wd):
    _dec_body(x_ref[0], w_ref, b_ref, o_ref, Hd, Wd)


def _dec_add_kernel(x_ref, a_ref, w_ref, b_ref, o_ref, *, Hd, Wd):
    # skip add in f32, then cast for the MXU matmul
    x = (x_ref[0].astype(jnp.float32)
         + a_ref[0].astype(jnp.float32)).astype(x_ref.dtype)
    _dec_body(x, w_ref, b_ref, o_ref, Hd, Wd)


def decoder_block(x_nhwc, w, b, skip=None, *, compute_dtype, out_dtype):
    N, Hd, Wd, cin = x_nhwc.shape
    two_cout = w.shape[-1]
    cout = two_cout // 2
    x2 = x_nhwc.reshape(N, Hd * Wd, cin).astype(compute_dtype)
    in_specs = [pl.BlockSpec((1, Hd * Wd, cin), lambda n: (n, 0, 0))]
    args = [x2]
    kern = _dec_kernel
    if skip is not None:
        a2 = skip.reshape(N, Hd * Wd, cin).astype(compute_dtype)
        in_specs.append(pl.BlockSpec((1, Hd * Wd, cin), lambda n: (n, 0, 0)))
        args.append(a2)
        kern = _dec_add_kernel
    in_specs += [pl.BlockSpec((2, cin, two_cout), lambda n: (0, 0, 0)),
                 pl.BlockSpec((2, 1, two_cout), lambda n: (0, 0, 0))]
    args += [w, b]
    itemsize = jnp.dtype(compute_dtype).itemsize
    flops = 2 * N * Hd * Wd * cin * 2 * two_cout
    bytes_acc = (x2.size * itemsize * (2 if skip is not None else 1)
                 + w.size * itemsize
                 + N * Hd * 2 * Wd * two_cout * jnp.dtype(out_dtype).itemsize)
    out = pl.pallas_call(
        functools.partial(kern, Hd=Hd, Wd=Wd),
        out_shape=jax.ShapeDtypeStruct((N, Hd, 2, Wd, two_cout), out_dtype),
        grid=(N,),
        in_specs=in_specs,
        out_specs=pl.BlockSpec((1, Hd, 2, Wd, two_cout),
                               lambda n: (n, 0, 0, 0, 0)),
        compiler_params=_cparams(),
        cost_estimate=_cost(flops, bytes_acc),
    )(*args)
    # free contiguous reshape: [N, Hd, 2, Wd, 2, cout] -> [N, 2Hd, 2Wd, cout]
    return out.reshape(N, 2 * Hd, 2 * Wd, cout)


# ----------------------------------------------------------------------------
# Generic row-tiled matmul (used for the fused residual + pw_final + heads).
# ----------------------------------------------------------------------------
def _mm_kernel(x_ref, w_ref, b_ref, o_ref, *, relu):
    acc = jnp.dot(x_ref[...], w_ref[...], preferred_element_type=jnp.float32)
    acc = acc + b_ref[...].astype(jnp.float32)
    if relu:
        acc = jnp.maximum(acc, 0.0)
    o_ref[...] = acc.astype(o_ref.dtype)


def _mm_add_kernel(x_ref, a_ref, w_ref, b_ref, o_ref, *, relu):
    x = (x_ref[...].astype(jnp.float32)
         + a_ref[...].astype(jnp.float32)).astype(x_ref.dtype)
    acc = jnp.dot(x, w_ref[...], preferred_element_type=jnp.float32)
    acc = acc + b_ref[...].astype(jnp.float32)
    if relu:
        acc = jnp.maximum(acc, 0.0)
    o_ref[...] = acc.astype(o_ref.dtype)


def _pick_bm(M):
    """Row tile: large, VMEM-safe, and >=2 grid steps so v7x megacore is used."""
    if M <= 16:
        return M
    half = (M + 1) // 2
    half = ((half + 7) // 8) * 8
    return max(8, min(ROW_TILE_CAP, half, M))


def fused_matmul(x2, w, b, add2=None, relu=False,
                 compute_dtype=jnp.bfloat16, out_dtype=jnp.float32):
    """y = relu((x2 [+ add2]) @ w + b).  x2/add2: [M,K], w: [K,Cout], b: [1,Cout]."""
    M, K = x2.shape
    Cout = w.shape[1]
    bm = _pick_bm(M)
    grid = (pl.cdiv(M, bm),)

    x2 = x2.astype(compute_dtype)
    w = w.astype(compute_dtype)
    b = b.astype(jnp.float32)

    x_spec = pl.BlockSpec((bm, K), lambda i: (i, 0))
    w_spec = pl.BlockSpec((K, Cout), lambda i: (0, 0))
    b_spec = pl.BlockSpec((1, Cout), lambda i: (0, 0))
    o_spec = pl.BlockSpec((bm, Cout), lambda i: (i, 0))
    out_shape = jax.ShapeDtypeStruct((M, Cout), out_dtype)
    itemsize = jnp.dtype(compute_dtype).itemsize
    flops = 2 * M * K * Cout
    bytes_acc = (M * K * itemsize * (2 if add2 is not None else 1)
                 + K * Cout * itemsize + M * Cout * jnp.dtype(out_dtype).itemsize)

    if add2 is None:
        return pl.pallas_call(
            functools.partial(_mm_kernel, relu=relu),
            out_shape=out_shape, grid=grid,
            in_specs=[x_spec, w_spec, b_spec], out_specs=o_spec,
            compiler_params=_cparams(), cost_estimate=_cost(flops, bytes_acc),
        )(x2, w, b)

    a_spec = pl.BlockSpec((bm, K), lambda i: (i, 0))
    return pl.pallas_call(
        functools.partial(_mm_add_kernel, relu=relu),
        out_shape=out_shape, grid=grid,
        in_specs=[x_spec, a_spec, w_spec, b_spec], out_specs=o_spec,
        compiler_params=_cparams(), cost_estimate=_cost(flops, bytes_acc),
    )(x2, add2, w, b)


# ----------------------------------------------------------------------------
# XLA glue: center pad OR crop (matches F.pad with possibly-negative widths).
# ----------------------------------------------------------------------------
def center_resize(x, Ht, Wt):
    def fix(x, axis, target):
        cur = x.shape[axis]
        left = (target - cur) // 2
        right = target - cur - left
        if left < 0 or right < 0:
            start = max(-left, 0)
            stop = cur + min(right, 0)
            x = lax.slice_in_dim(x, start, stop, axis=axis)
            left, right = max(left, 0), max(right, 0)
        if left or right:
            pads = [(0, 0)] * x.ndim
            pads[axis] = (left, right)
            x = jnp.pad(x, pads)
        return x

    x = fix(x, 1, Ht)
    x = fix(x, 2, Wt)
    return x


# ----------------------------------------------------------------------------
# Parameter init (deterministic, synthetic) + one-time fused-weight prep.
# ----------------------------------------------------------------------------
def init_params(key, channel_list, head_list, head_out_channels=3):
    keys = iter(jax.random.split(key, 128))

    def w(shape, scale=0.1):
        return scale * jax.random.normal(next(keys), shape, dtype=jnp.float32)

    num_blocks = len(channel_list) - 1
    params = {"enc": [], "dec": [], "inter": [], "head": []}

    for idx in range(num_blocks):
        cin, cout = channel_list[idx], channel_list[idx + 1]
        params["enc"].append({
            "dw_w": w((9, cin)), "dw_b": w((1, cin)),
            "pw_w": w((cin, cout)), "pw_b": w((1, cout)),
        })

    cl = channel_list[-1]
    params["bottleneck"] = {"w": w((cl, cl)), "b": w((1, cl))}

    rev = channel_list[::-1]
    for idx in range(num_blocks):
        cin, cout = rev[idx], rev[idx + 1]
        params["dec"].append({
            "dwt_w": w((4, cin)), "dwt_b": w((1, cin)),
            "pw_w": w((cin, cout)), "pw_b": w((1, cout)),
        })

    c0 = channel_list[0]
    params["pw_final"] = {"w": w((c0, c0)), "b": w((1, c0))}

    for _head, num_in_features in head_list:
        params["inter"].append({"w": w((c0, num_in_features)),
                                "b": w((1, num_in_features))})
        params["head"].append({"w": w((num_in_features, head_out_channels)),
                               "b": w((1, head_out_channels))})
    return params


def prepare_fused_params(params, channel_list, head_list,
                         compute_dtype=jnp.bfloat16):
    """Exact algebraic fusions, computed ONCE outside the jitted forward."""
    num_blocks = len(channel_list) - 1
    fp = {"enc": [], "dec": [], "head_cols": []}

    # Encoder: dw 3x3 s2 + pw 1x1 -> per-kh column-group weights.
    for idx in range(num_blocks):
        p = params["enc"][idx]
        cin, cout = channel_list[idx], channel_list[idx + 1]
        taps = p["dw_w"][:, :, None] * p["pw_w"][None, :, :]        # [9,cin,cout]
        wa = jnp.stack([jnp.concatenate([taps[kh * 3 + 0], taps[kh * 3 + 1]],
                                        axis=0) for kh in range(3)], axis=0)
        wb = jnp.stack([jnp.concatenate([taps[kh * 3 + 2],
                                         jnp.zeros((cin, cout), jnp.float32)],
                                        axis=0) for kh in range(3)], axis=0)
        b = p["dw_b"] @ p["pw_w"] + p["pw_b"]
        fp["enc"].append({"wa": wa.astype(compute_dtype),
                          "wb": wb.astype(compute_dtype),
                          "b": b.astype(jnp.float32)})

    # Decoder: dw 2x2 s2 deconv + pw 1x1 -> per-h-phase weights; fold the
    # (linear 1x1) bottleneck into decoder block 0.
    rev = channel_list[::-1]
    for idx in range(num_blocks):
        p = params["dec"][idx]
        cin, cout = rev[idx], rev[idx + 1]
        taps = p["dwt_w"][:, :, None] * p["pw_w"][None, :, :]       # [4,cin,cout]
        w_hp = jnp.stack([jnp.concatenate([taps[hp * 2 + 0], taps[hp * 2 + 1]],
                                          axis=1) for hp in range(2)], axis=0)
        b_tap = p["dwt_b"] @ p["pw_w"] + p["pw_b"]                  # [1,cout]
        b_pair = jnp.tile(b_tap, (1, 2))                            # [1,2cout]
        if idx == 0:
            Wb, bb = params["bottleneck"]["w"], params["bottleneck"]["b"]
            b_hp = jnp.stack([bb @ w_hp[hp] + b_pair for hp in range(2)], axis=0)
            w_hp = jnp.stack([Wb @ w_hp[hp] for hp in range(2)], axis=0)
        else:
            b_hp = jnp.stack([b_pair, b_pair], axis=0)
        fp["dec"].append({"w": w_hp.astype(compute_dtype),
                          "b": b_hp.astype(jnp.float32)})

    # Final: pw_final + every head (inter 1x1 + head 1x1), one wide matmul.
    c0 = channel_list[0]
    Wf, bf = params["pw_final"]["w"], params["pw_final"]["b"]
    w_cols, b_cols, head_cols = [Wf], [bf], []
    for idx in range(len(head_list)):
        pi, ph = params["inter"][idx], params["head"][idx]
        Wh = pi["w"] @ ph["w"]
        bh = pi["b"] @ ph["w"] + ph["b"]
        w_cols.append(Wf @ Wh)
        b_cols.append(bf @ Wh + bh)
        head_cols.append(ph["w"].shape[1])
    fp["final"] = {"w": jnp.concatenate(w_cols, axis=1).astype(compute_dtype),
                   "b": jnp.concatenate(b_cols, axis=1).astype(jnp.float32)}
    fp["head_cols"] = head_cols
    return fp


# ----------------------------------------------------------------------------
# UNet forward (separable=True, dilated=False, batch_norm=False,
#               head_relu=False, potential_map=False)
# ----------------------------------------------------------------------------
def unet_forward(x_nchw, fused, channel_list, head_list,
                 compute_dtype=jnp.bfloat16):
    x = jnp.transpose(x_nchw, (0, 2, 3, 1)).astype(jnp.float32)   # NCHW -> NHWC
    residual = x
    num_blocks = len(channel_list) - 1

    # ---------------- Encoder ----------------
    skips, h = [], x
    for idx in range(num_blocks):
        p = fused["enc"][idx]
        h = encoder_block(h, p["wa"], p["wb"], p["b"],
                          compute_dtype=compute_dtype, out_dtype=compute_dtype)
        if idx != num_blocks - 1:
            skips.append(h)

    # ---------------- Decoder (bottleneck folded into block 0) ----------------
    pending = None
    for idx in range(num_blocks):
        p = fused["dec"][idx]
        h = decoder_block(h, p["w"], p["b"], skip=pending,
                          compute_dtype=compute_dtype, out_dtype=compute_dtype)
        if idx != num_blocks - 1:
            s = skips[-idx - 1]
            h = center_resize(h, s.shape[1], s.shape[2])
            pending = s                     # fused into next block's kernel
        else:
            pending = None

    # -------- Residual add + pw_final + all heads in ONE wide matmul --------
    h = center_resize(h, residual.shape[1], residual.shape[2])
    N, H, W, c0 = residual.shape
    rows = N * H * W
    y = fused_matmul(h.reshape(rows, c0), fused["final"]["w"],
                     fused["final"]["b"], add2=residual.reshape(rows, c0),
                     relu=False, compute_dtype=compute_dtype,
                     out_dtype=jnp.float32)
    out = y[:, :c0].reshape(N, H, W, c0)
    inter = {}
    off = c0
    for (head, _nf), hc in zip(head_list, fused["head_cols"]):
        inter[head] = y[:, off:off + hc].reshape(N, H, W, hc)
        off += hc

    out_nchw = jnp.transpose(out, (0, 3, 1, 2))
    inter_nchw = {k: jnp.transpose(v, (0, 3, 1, 2)) for k, v in inter.items()}
    return out_nchw, inter_nchw


# ----------------------------------------------------------------------------
if __name__ == "__main__":
    key = jax.random.PRNGKey(0)
    k_param, k_in = jax.random.split(key)

    channel_list = [4, 8, 16]
    head_list = [("head0", 8)]          # (name, num_in_features)
    COMPUTE_DTYPE = jnp.bfloat16        # bf16 operands/intermediates, f32 accum

    params = init_params(k_param, channel_list, head_list, head_out_channels=3)
    fused = prepare_fused_params(params, channel_list, head_list,
                                 compute_dtype=COMPUTE_DTYPE)

    x = jax.random.normal(k_in, (2, 4, 16, 16), dtype=jnp.float32)  # NCHW

    fwd = jax.jit(lambda inp: unet_forward(inp, fused, channel_list, head_list,
                                           compute_dtype=COMPUTE_DTYPE))
    out, inter = fwd(x)

    jax.block_until_ready(out)
    for v in inter.values():
        jax.block_until_ready(v)

    assert out.shape == (2, 4, 16, 16)
    assert inter["head0"].shape == (2, 3, 16, 16)
    print("KERNEL_OK")
</pallas_src>

<mosaic_0001>
module attributes {stable_mosaic.version = 11 : i64} {
  func.func @_enc_kernel(%arg0: i32, %arg1: memref<1x9x2x9x8xbf16, #tpu.memory_space<vmem>>, %arg2: memref<3x8x8xbf16, #tpu.memory_space<vmem>>, %arg3: memref<3x8x8xbf16, #tpu.memory_space<vmem>>, %arg4: memref<1x8xf32, #tpu.memory_space<vmem>>, %arg5: memref<1x64x8xbf16, #tpu.memory_space<vmem>>) attributes {dimension_semantics = [#tpu.dimension_semantics<parallel>], iteration_bounds = array<i64: 2>, scalar_prefetch = 0 : i64, scratch_operands = 0 : i64, tpu.core_type = #tpu.core_type<tc>, window_params = [{transform_indices = @transform_0, window_bounds = array<i64: 1, 9, 2, 9, 8>}, {pipeline_mode = #tpu.pipeline_mode<synchronous>, transform_indices = @transform_1, window_bounds = array<i64: 3, 8, 8>}, {pipeline_mode = #tpu.pipeline_mode<synchronous>, transform_indices = @transform_2, window_bounds = array<i64: 3, 8, 8>}, {pipeline_mode = #tpu.pipeline_mode<synchronous>, transform_indices = @transform_3, window_bounds = array<i64: 1, 8>}, {transform_indices = @transform_4, window_bounds = array<i64: 1, 64, 8>}]} {
    %cst = arith.constant 0.000000e+00 : f32
    %0 = vector.broadcast %cst : f32 to vector<64x8xf32>
    %c0 = arith.constant 0 : index
    %c0_0 = arith.constant 0 : index
    %c0_1 = arith.constant 0 : index
    %c0_2 = arith.constant 0 : index
    %c0_3 = arith.constant 0 : index
    %1 = vector.load %arg1[%c0, %c0_0, %c0_1, %c0_2, %c0_3] : memref<1x9x2x9x8xbf16, #tpu.memory_space<vmem>>, vector<1x8x1x8x8xbf16>
    %2 = vector.shape_cast %1 : vector<1x8x1x8x8xbf16> to vector<8x8x8xbf16>
    %3 = vector.shape_cast %2 : vector<8x8x8xbf16> to vector<64x8xbf16>
    %c0_4 = arith.constant 0 : index
    %c0_5 = arith.constant 0 : index
    %c0_6 = arith.constant 0 : index
    %c1 = arith.constant 1 : index
    %c0_7 = arith.constant 0 : index
    %4 = vector.load %arg1[%c0_4, %c0_5, %c0_6, %c1, %c0_7] : memref<1x9x2x9x8xbf16, #tpu.memory_space<vmem>>, vector<1x8x1x8x8xbf16>
    %5 = vector.shape_cast %4 : vector<1x8x1x8x8xbf16> to vector<8x8x8xbf16>
    %6 = vector.shape_cast %5 : vector<8x8x8xbf16> to vector<64x8xbf16>
    %c0_8 = arith.constant 0 : index
    %c0_9 = arith.constant 0 : index
    %c0_10 = arith.constant 0 : index
    %7 = vector.load %arg2[%c0_8, %c0_9, %c0_10] : memref<3x8x8xbf16, #tpu.memory_space<vmem>>, vector<1x8x8xbf16>
    %8 = vector.shape_cast %7 : vector<1x8x8xbf16> to vector<8x8xbf16>
    %cst_11 = arith.constant dense<0.000000e+00> : vector<64x8xf32>
    %9 = tpu.matmul %3, %8, %cst_11 {dimension_numbers = #tpu.dot_dimension_numbers<[1], [0], [0], [1], [0, 0, 1, 1], [], []>} : vector<64x8xbf16>, vector<8x8xbf16>, vector<64x8xf32> -> vector<64x8xf32>
    %10 = arith.addf %0, %9 : vector<64x8xf32>
    %c0_12 = arith.constant 0 : index
    %c0_13 = arith.constant 0 : index
    %c0_14 = arith.constant 0 : index
    %11 = vector.load %arg3[%c0_12, %c0_13, %c0_14] : memref<3x8x8xbf16, #tpu.memory_space<vmem>>, vector<1x8x8xbf16>
    %12 = vector.shape_cast %11 : vector<1x8x8xbf16> to vector<8x8xbf16>
    %cst_15 = arith.constant dense<0.000000e+00> : vector<64x8xf32>
    %13 = tpu.matmul %6, %12, %cst_15 {dimension_numbers = #tpu.dot_dimension_numbers<[1], [0], [0], [1], [0, 0, 1, 1], [], []>} : vector<64x8xbf16>, vector<8x8xbf16>, vector<64x8xf32> -> vector<64x8xf32>
    %14 = arith.addf %10, %13 : vector<64x8xf32>
    %c0_16 = arith.constant 0 : index
    %c0_17 = arith.constant 0 : index
    %c1_18 = arith.constant 1 : index
    %c0_19 = arith.constant 0 : index
    %c0_20 = arith.constant 0 : index
    %15 = vector.load %arg1[%c0_16, %c0_17, %c1_18, %c0_19, %c0_20] : memref<1x9x2x9x8xbf16, #tpu.memory_space<vmem>>, vector<1x8x1x8x8xbf16>
    %16 = vector.shape_cast %15 : vector<1x8x1x8x8xbf16> to vector<8x8x8xbf16>
    %17 = vector.shape_cast %16 : vector<8x8x8xbf16> to vector<64x8xbf16>
    %c0_21 = arith.constant 0 : index
    %c0_22 = arith.constant 0 : index
    %c1_23 = arith.constant 1 : index
    %c1_24 = arith.constant 1 : index
    %c0_25 = arith.constant 0 : index
    %18 = vector.load %arg1[%c0_21, %c0_22, %c1_23, %c1_24, %c0_25] : memref<1x9x2x9x8xbf16, #tpu.memory_space<vmem>>, vector<1x8x1x8x8xbf16>
    %19 = vector.shape_cast %18 : vector<1x8x1x8x8xbf16> to vector<8x8x8xbf16>
    %20 = vector.shape_cast %19 : vector<8x8x8xbf16> to vector<64x8xbf16>
    %c1_26 = arith.constant 1 : index
    %c0_27 = arith.constant 0 : index
    %c0_28 = arith.constant 0 : index
    %21 = vector.load %arg2[%c1_26, %c0_27, %c0_28] : memref<3x8x8xbf16, #tpu.memory_space<vmem>>, vector<1x8x8xbf16>
    %22 = vector.shape_cast %21 : vector<1x8x8xbf16> to vector<8x8xbf16>
    %cst_29 = arith.constant dense<0.000000e+00> : vector<64x8xf32>
    %23 = tpu.matmul %17, %22, %cst_29 {dimension_numbers = #tpu.dot_dimension_numbers<[1], [0], [0], [1], [0, 0, 1, 1], [], []>} : vector<64x8xbf16>, vector<8x8xbf16>, vector<64x8xf32> -> vector<64x8xf32>
    %24 = arith.addf %14, %23 : vector<64x8xf32>
    %c1_30 = arith.constant 1 : index
    %c0_31 = arith.constant 0 : index
    %c0_32 = arith.constant 0 : index
    %25 = vector.load %arg3[%c1_30, %c0_31, %c0_32] : memref<3x8x8xbf16, #tpu.memory_space<vmem>>, vector<1x8x8xbf16>
    %26 = vector.shape_cast %25 : vector<1x8x8xbf16> to vector<8x8xbf16>
    %cst_33 = arith.constant dense<0.000000e+00> : vector<64x8xf32>
    %27 = tpu.matmul %20, %26, %cst_33 {dimension_numbers = #tpu.dot_dimension_numbers<[1], [0], [0], [1], [0, 0, 1, 1], [], []>} : vector<64x8xbf16>, vector<8x8xbf16>, vector<64x8xf32> -> vector<64x8xf32>
    %28 = arith.addf %24, %27 : vector<64x8xf32>
    %c0_34 = arith.constant 0 : index
    %c1_35 = arith.constant 1 : index
    %c0_36 = arith.constant 0 : index
    %c0_37 = arith.constant 0 : index
    %c0_38 = arith.constant 0 : index
    %29 = vector.load %arg1[%c0_34, %c1_35, %c0_36, %c0_37, %c0_38] : memref<1x9x2x9x8xbf16, #tpu.memory_space<vmem>>, vector<1x8x1x8x8xbf16>
    %30 = vector.shape_cast %29 : vector<1x8x1x8x8xbf16> to vector<8x8x8xbf16>
    %31 = vector.shape_cast %30 : vector<8x8x8xbf16> to vector<64x8xbf16>
    %c0_39 = arith.constant 0 : index
    %c1_40 = arith.constant 1 : index
    %c0_41 = arith.constant 0 : index
    %c1_42 = arith.constant 1 : index
    %c0_43 = arith.constant 0 : index
    %32 = vector.load %arg1[%c0_39, %c1_40, %c0_41, %c1_42, %c0_43] : memref<1x9x2x9x8xbf16, #tpu.memory_space<vmem>>, vector<1x8x1x8x8xbf16>
    %33 = vector.shape_cast %32 : vector<1x8x1x8x8xbf16> to vector<8x8x8xbf16>
    %34 = vector.shape_cast %33 : vector<8x8x8xbf16> to vector<64x8xbf16>
    %c2 = arith.constant 2 : index
    %c0_44 = arith.constant 0 : index
    %c0_45 = arith.constant 0 : index
    %35 = vector.load %arg2[%c2, %c0_44, %c0_45] : memref<3x8x8xbf16, #tpu.memory_space<vmem>>, vector<1x8x8xbf16>
    %36 = vector.shape_cast %35 : vector<1x8x8xbf16> to vector<8x8xbf16>
    %cst_46 = arith.constant dense<0.000000e+00> : vector<64x8xf32>
    %37 = tpu.matmul %31, %36, %cst_46 {dimension_numbers = #tpu.dot_dimension_numbers<[1], [0], [0], [1], [0, 0, 1, 1], [], []>} : vector<64x8xbf16>, vector<8x8xbf16>, vector<64x8xf32> -> vector<64x8xf32>
    %38 = arith.addf %28, %37 : vector<64x8xf32>
    %c2_47 = arith.constant 2 : index
    %c0_48 = arith.constant 0 : index
    %c0_49 = arith.constant 0 : index
    %39 = vector.load %arg3[%c2_47, %c0_48, %c0_49] : memref<3x8x8xbf16, #tpu.memory_space<vmem>>, vector<1x8x8xbf16>
    %40 = vector.shape_cast %39 : vector<1x8x8xbf16> to vector<8x8xbf16>
    %cst_50 = arith.constant dense<0.000000e+00> : vector<64x8xf32>
    %41 = tpu.matmul %34, %40, %cst_50 {dimension_numbers = #tpu.dot_dimension_numbers<[1], [0], [0], [1], [0, 0, 1, 1], [], []>} : vector<64x8xbf16>, vector<8x8xbf16>, vector<64x8xf32> -> vector<64x8xf32>
    %42 = arith.addf %38, %41 : vector<64x8xf32>
    %c0_51 = arith.constant 0 : index
    %c0_52 = arith.constant 0 : index
    %43 = vector.load %arg4[%c0_51, %c0_52] : memref<1x8xf32, #tpu.memory_space<vmem>>, vector<1x8xf32>
    %44 = vector.broadcast %43 : vector<1x8xf32> to vector<64x8xf32>
    %45 = arith.addf %42, %44 : vector<64x8xf32>
    %cst_53 = arith.constant 0.000000e+00 : f32
    %46 = vector.broadcast %cst_53 : f32 to vector<64x8xf32>
    %47 = arith.maximumf %45, %46 : vector<64x8xf32>
    %48 = arith.truncf %47 : vector<64x8xf32> to vector<64x8xbf16>
    %c0_54 = arith.constant 0 : index
    %c0_55 = arith.constant 0 : index
    %c0_56 = arith.constant 0 : index
    %49 = vector.load %arg5[%c0_54, %c0_55, %c0_56] : memref<1x64x8xbf16, #tpu.memory_space<vmem>>, vector<1x64x8xbf16>
    %50 = vector.shape_cast %49 : vector<1x64x8xbf16> to vector<64x8xbf16>
    %51 = vector.shape_cast %48 : vector<64x8xbf16> to vector<1x64x8xbf16>
    tpu.vector_store %arg5[%c0_54, %c0_55, %c0_56], %51 {strides = array<i32>} : memref<1x64x8xbf16, #tpu.memory_space<vmem>>, vector<1x64x8xbf16>,
    return
  }
  func.func @transform_0(%arg0: i32) -> (i32, i32, i32, i32, i32) {
    %c0_i32 = arith.constant 0 : i32
    %c0_i32_0 = arith.constant 0 : i32
    %c0_i32_1 = arith.constant 0 : i32
    %c0_i32_2 = arith.constant 0 : i32
    %c0_i32_3 = arith.constant 0 : i32
    return %arg0, %c0_i32, %c0_i32_0, %c0_i32_1, %c0_i32_2 : i32, i32, i32, i32, i32
  }
  func.func @transform_1(%arg0: i32) -> (i32, i32, i32) {
    %c0_i32 = arith.constant 0 : i32
    %c0_i32_0 = arith.constant 0 : i32
    %c0_i32_1 = arith.constant 0 : i32
    %c0_i32_2 = arith.constant 0 : i32
    return %c0_i32, %c0_i32_0, %c0_i32_1 : i32, i32, i32
  }
  func.func @transform_2(%arg0: i32) -> (i32, i32, i32) {
    %c0_i32 = arith.constant 0 : i32
    %c0_i32_0 = arith.constant 0 : i32
    %c0_i32_1 = arith.constant 0 : i32
    %c0_i32_2 = arith.constant 0 : i32
    return %c0_i32, %c0_i32_0, %c0_i32_1 : i32, i32, i32
  }
  func.func @transform_3(%arg0: i32) -> (i32, i32) {
    %c0_i32 = arith.constant 0 : i32
    %c0_i32_0 = arith.constant 0 : i32
    %c0_i32_1 = arith.constant 0 : i32
    return %c0_i32, %c0_i32_0 : i32, i32
  }
  func.func @transform_4(%arg0: i32) -> (i32, i32, i32) {
    %c0_i32 = arith.constant 0 : i32
    %c0_i32_0 = arith.constant 0 : i32
    %c0_i32_1 = arith.constant 0 : i32
    return %arg0, %c0_i32, %c0_i32_0 : i32, i32, i32
  }
}

module attributes {stable_mosaic.version = 11 : i64} {
  func.func @_enc_kernel(%arg0: i32, %arg1: memref<1x5x2x5x16xbf16, #tpu.memory_space<vmem>>, %arg2: memref<3x16x16xbf16, #tpu.memory_space<vmem>>, %arg3: memref<3x16x16xbf16, #tpu.memory_space<vmem>>, %arg4: memref<1x16xf32, #tpu.memory_space<vmem>>, %arg5: memref<1x16x16xbf16, #tpu.memory_space<vmem>>) attributes {dimension_semantics = [#tpu.dimension_semantics<parallel>], iteration_bounds = array<i64: 2>, scalar_prefetch = 0 : i64, scratch_operands = 0 : i64, tpu.core_type = #tpu.core_type<tc>, window_params = [{transform_indices = @transform_0, window_bounds = array<i64: 1, 5, 2, 5, 16>}, {pipeline_mode = #tpu.pipeline_mode<synchronous>, transform_indices = @transform_1, window_bounds = array<i64: 3, 16, 16>}, {pipeline_mode = #tpu.pipeline_mode<synchronous>, transform_indices = @transform_2, window_bounds = array<i64: 3, 16, 16>}, {pipeline_mode = #tpu.pipeline_mode<synchronous>, transform_indices = @transform_3, window_bounds = array<i64: 1, 16>}, {transform_indices = @transform_4, window_bounds = array<i64: 1, 16, 16>}]} {
    %cst = arith.constant 0.000000e+00 : f32
    %0 = vector.broadcast %cst : f32 to vector<16x16xf32>
    %c0 = arith.constant 0 : index
    %c0_0 = arith.constant 0 : index
    %c0_1 = arith.constant 0 : index
    %c0_2 = arith.constant 0 : index
    %c0_3 = arith.constant 0 : index
    %1 = vector.load %arg1[%c0, %c0_0, %c0_1, %c0_2, %c0_3] : memref<1x5x2x5x16xbf16, #tpu.memory_space<vmem>>, vector<1x4x1x4x16xbf16>
    %2 = vector.shape_cast %1 : vector<1x4x1x4x16xbf16> to vector<4x4x16xbf16>
    %3 = vector.shape_cast %2 : vector<4x4x16xbf16> to vector<16x16xbf16>
    %c0_4 = arith.constant 0 : index
    %c0_5 = arith.constant 0 : index
    %c0_6 = arith.constant 0 : index
    %c1 = arith.constant 1 : index
    %c0_7 = arith.constant 0 : index
    %4 = vector.load %arg1[%c0_4, %c0_5, %c0_6, %c1, %c0_7] : memref<1x5x2x5x16xbf16, #tpu.memory_space<vmem>>, vector<1x4x1x4x16xbf16>
    %5 = vector.shape_cast %4 : vector<1x4x1x4x16xbf16> to vector<4x4x16xbf16>
    %6 = vector.shape_cast %5 : vector<4x4x16xbf16> to vector<16x16xbf16>
    %c0_8 = arith.constant 0 : index
    %c0_9 = arith.constant 0 : index
    %c0_10 = arith.constant 0 : index
    %7 = vector.load %arg2[%c0_8, %c0_9, %c0_10] : memref<3x16x16xbf16, #tpu.memory_space<vmem>>, vector<1x16x16xbf16>
    %8 = vector.shape_cast %7 : vector<1x16x16xbf16> to vector<16x16xbf16>
    %cst_11 = arith.constant dense<0.000000e+00> : vector<16x16xf32>
    %9 = tpu.matmul %3, %8, %cst_11 {dimension_numbers = #tpu.dot_dimension_numbers<[1], [0], [0], [1], [0, 0, 1, 1], [], []>} : vector<16x16xbf16>, vector<16x16xbf16>, vector<16x16xf32> -> vector<16x16xf32>
    %10 = arith.addf %0, %9 : vector<16x16xf32>
    %c0_12 = arith.constant 0 : index
    %c0_13 = arith.constant 0 : index
    %c0_14 = arith.constant 0 : index
    %11 = vector.load %arg3[%c0_12, %c0_13, %c0_14] : memref<3x16x16xbf16, #tpu.memory_space<vmem>>, vector<1x16x16xbf16>
    %12 = vector.shape_cast %11 : vector<1x16x16xbf16> to vector<16x16xbf16>
    %cst_15 = arith.constant dense<0.000000e+00> : vector<16x16xf32>
    %13 = tpu.matmul %6, %12, %cst_15 {dimension_numbers = #tpu.dot_dimension_numbers<[1], [0], [0], [1], [0, 0, 1, 1], [], []>} : vector<16x16xbf16>, vector<16x16xbf16>, vector<16x16xf32> -> vector<16x16xf32>
    %14 = arith.addf %10, %13 : vector<16x16xf32>
    %c0_16 = arith.constant 0 : index
    %c0_17 = arith.constant 0 : index
    %c1_18 = arith.constant 1 : index
    %c0_19 = arith.constant 0 : index
    %c0_20 = arith.constant 0 : index
    %15 = vector.load %arg1[%c0_16, %c0_17, %c1_18, %c0_19, %c0_20] : memref<1x5x2x5x16xbf16, #tpu.memory_space<vmem>>, vector<1x4x1x4x16xbf16>
    %16 = vector.shape_cast %15 : vector<1x4x1x4x16xbf16> to vector<4x4x16xbf16>
    %17 = vector.shape_cast %16 : vector<4x4x16xbf16> to vector<16x16xbf16>
    %c0_21 = arith.constant 0 : index
    %c0_22 = arith.constant 0 : index
    %c1_23 = arith.constant 1 : index
    %c1_24 = arith.constant 1 : index
    %c0_25 = arith.constant 0 : index
    %18 = vector.load %arg1[%c0_21, %c0_22, %c1_23, %c1_24, %c0_25] : memref<1x5x2x5x16xbf16, #tpu.memory_space<vmem>>, vector<1x4x1x4x16xbf16>
    %19 = vector.shape_cast %18 : vector<1x4x1x4x16xbf16> to vector<4x4x16xbf16>
    %20 = vector.shape_cast %19 : vector<4x4x16xbf16> to vector<16x16xbf16>
    %c1_26 = arith.constant 1 : index
    %c0_27 = arith.constant 0 : index
    %c0_28 = arith.constant 0 : index
    %21 = vector.load %arg2[%c1_26, %c0_27, %c0_28] : memref<3x16x16xbf16, #tpu.memory_space<vmem>>, vector<1x16x16xbf16>
    %22 = vector.shape_cast %21 : vector<1x16x16xbf16> to vector<16x16xbf16>
    %cst_29 = arith.constant dense<0.000000e+00> : vector<16x16xf32>
    %23 = tpu.matmul %17, %22, %cst_29 {dimension_numbers = #tpu.dot_dimension_numbers<[1], [0], [0], [1], [0, 0, 1, 1], [], []>} : vector<16x16xbf16>, vector<16x16xbf16>, vector<16x16xf32> -> vector<16x16xf32>
    %24 = arith.addf %14, %23 : vector<16x16xf32>
    %c1_30 = arith.constant 1 : index
    %c0_31 = arith.constant 0 : index
    %c0_32 = arith.constant 0 : index
    %25 = vector.load %arg3[%c1_30, %c0_31, %c0_32] : memref<3x16x16xbf16, #tpu.memory_space<vmem>>, vector<1x16x16xbf16>
    %26 = vector.shape_cast %25 : vector<1x16x16xbf16> to vector<16x16xbf16>
    %cst_33 = arith.constant dense<0.000000e+00> : vector<16x16xf32>
    %27 = tpu.matmul %20, %26, %cst_33 {dimension_numbers = #tpu.dot_dimension_numbers<[1], [0], [0], [1], [0, 0, 1, 1], [], []>} : vector<16x16xbf16>, vector<16x16xbf16>, vector<16x16xf32> -> vector<16x16xf32>
    %28 = arith.addf %24, %27 : vector<16x16xf32>
    %c0_34 = arith.constant 0 : index
    %c1_35 = arith.constant 1 : index
    %c0_36 = arith.constant 0 : index
    %c0_37 = arith.constant 0 : index
    %c0_38 = arith.constant 0 : index
    %29 = vector.load %arg1[%c0_34, %c1_35, %c0_36, %c0_37, %c0_38] : memref<1x5x2x5x16xbf16, #tpu.memory_space<vmem>>, vector<1x4x1x4x16xbf16>
    %30 = vector.shape_cast %29 : vector<1x4x1x4x16xbf16> to vector<4x4x16xbf16>
    %31 = vector.shape_cast %30 : vector<4x4x16xbf16> to vector<16x16xbf16>
    %c0_39 = arith.constant 0 : index
    %c1_40 = arith.constant 1 : index
    %c0_41 = arith.constant 0 : index
    %c1_42 = arith.constant 1 : index
    %c0_43 = arith.constant 0 : index
    %32 = vector.load %arg1[%c0_39, %c1_40, %c0_41, %c1_42, %c0_43] : memref<1x5x2x5x16xbf16, #tpu.memory_space<vmem>>, vector<1x4x1x4x16xbf16>
    %33 = vector.shape_cast %32 : vector<1x4x1x4x16xbf16> to vector<4x4x16xbf16>
    %34 = vector.shape_cast %33 : vector<4x4x16xbf16> to vector<16x16xbf16>
    %c2 = arith.constant 2 : index
    %c0_44 = arith.constant 0 : index
    %c0_45 = arith.constant 0 : index
    %35 = vector.load %arg2[%c2, %c0_44, %c0_45] : memref<3x16x16xbf16, #tpu.memory_space<vmem>>, vector<1x16x16xbf16>
    %36 = vector.shape_cast %35 : vector<1x16x16xbf16> to vector<16x16xbf16>
    %cst_46 = arith.constant dense<0.000000e+00> : vector<16x16xf32>
    %37 = tpu.matmul %31, %36, %cst_46 {dimension_numbers = #tpu.dot_dimension_numbers<[1], [0], [0], [1], [0, 0, 1, 1], [], []>} : vector<16x16xbf16>, vector<16x16xbf16>, vector<16x16xf32> -> vector<16x16xf32>
    %38 = arith.addf %28, %37 : vector<16x16xf32>
    %c2_47 = arith.constant 2 : index
    %c0_48 = arith.constant 0 : index
    %c0_49 = arith.constant 0 : index
    %39 = vector.load %arg3[%c2_47, %c0_48, %c0_49] : memref<3x16x16xbf16, #tpu.memory_space<vmem>>, vector<1x16x16xbf16>
    %40 = vector.shape_cast %39 : vector<1x16x16xbf16> to vector<16x16xbf16>
    %cst_50 = arith.constant dense<0.000000e+00> : vector<16x16xf32>
    %41 = tpu.matmul %34, %40, %cst_50 {dimension_numbers = #tpu.dot_dimension_numbers<[1], [0], [0], [1], [0, 0, 1, 1], [], []>} : vector<16x16xbf16>, vector<16x16xbf16>, vector<16x16xf32> -> vector<16x16xf32>
    %42 = arith.addf %38, %41 : vector<16x16xf32>
    %c0_51 = arith.constant 0 : index
    %c0_52 = arith.constant 0 : index
    %43 = vector.load %arg4[%c0_51, %c0_52] : memref<1x16xf32, #tpu.memory_space<vmem>>, vector<1x16xf32>
    %44 = vector.broadcast %43 : vector<1x16xf32> to vector<16x16xf32>
    %45 = arith.addf %42, %44 : vector<16x16xf32>
    %cst_53 = arith.constant 0.000000e+00 : f32
    %46 = vector.broadcast %cst_53 : f32 to vector<16x16xf32>
    %47 = arith.maximumf %45, %46 : vector<16x16xf32>
    %48 = arith.truncf %47 : vector<16x16xf32> to vector<16x16xbf16>
    %c0_54 = arith.constant 0 : index
    %c0_55 = arith.constant 0 : index
    %c0_56 = arith.constant 0 : index
    %49 = vector.load %arg5[%c0_54, %c0_55, %c0_56] : memref<1x16x16xbf16, #tpu.memory_space<vmem>>, vector<1x16x16xbf16>
    %50 = vector.shape_cast %49 : vector<1x16x16xbf16> to vector<16x16xbf16>
    %51 = vector.shape_cast %48 : vector<16x16xbf16> to vector<1x16x16xbf16>
    tpu.vector_store %arg5[%c0_54, %c0_55, %c0_56], %51 {strides = array<i32>} : memref<1x16x16xbf16, #tpu.memory_space<vmem>>, vector<1x16x16xbf16>,
    return
  }
  func.func @transform_0(%arg0: i32) -> (i32, i32, i32, i32, i32) {
    %c0_i32 = arith.constant 0 : i32
    %c0_i32_0 = arith.constant 0 : i32
    %c0_i32_1 = arith.constant 0 : i32
    %c0_i32_2 = arith.constant 0 : i32
    %c0_i32_3 = arith.constant 0 : i32
    return %arg0, %c0_i32, %c0_i32_0, %c0_i32_1, %c0_i32_2 : i32, i32, i32, i32, i32
  }
  func.func @transform_1(%arg0: i32) -> (i32, i32, i32) {
    %c0_i32 = arith.constant 0 : i32
    %c0_i32_0 = arith.constant 0 : i32
    %c0_i32_1 = arith.constant 0 : i32
    %c0_i32_2 = arith.constant 0 : i32
    return %c0_i32, %c0_i32_0, %c0_i32_1 : i32, i32, i32
  }
  func.func @transform_2(%arg0: i32) -> (i32, i32, i32) {
    %c0_i32 = arith.constant 0 : i32
    %c0_i32_0 = arith.constant 0 : i32
    %c0_i32_1 = arith.constant 0 : i32
    %c0_i32_2 = arith.constant 0 : i32
    return %c0_i32, %c0_i32_0, %c0_i32_1 : i32, i32, i32
  }
  func.func @transform_3(%arg0: i32) -> (i32, i32) {
    %c0_i32 = arith.constant 0 : i32
    %c0_i32_0 = arith.constant 0 : i32
    %c0_i32_1 = arith.constant 0 : i32
    return %c0_i32, %c0_i32_0 : i32, i32
  }
  func.func @transform_4(%arg0: i32) -> (i32, i32, i32) {
    %c0_i32 = arith.constant 0 : i32
    %c0_i32_0 = arith.constant 0 : i32
    %c0_i32_1 = arith.constant 0 : i32
    return %arg0, %c0_i32, %c0_i32_0 : i32, i32, i32
  }
}

module attributes {stable_mosaic.version = 11 : i64} {
  func.func @_dec_kernel(%arg0: i32, %arg1: memref<1x16x16xbf16, #tpu.memory_space<vmem>>, %arg2: memref<2x16x16xbf16, #tpu.memory_space<vmem>>, %arg3: memref<2x1x16xf32, #tpu.memory_space<vmem>>, %arg4: memref<1x4x2x4x16xbf16, #tpu.memory_space<vmem>>) attributes {dimension_semantics = [#tpu.dimension_semantics<parallel>], iteration_bounds = array<i64: 2>, scalar_prefetch = 0 : i64, scratch_operands = 0 : i64, tpu.core_type = #tpu.core_type<tc>, window_params = [{transform_indices = @transform_0, window_bounds = array<i64: 1, 16, 16>}, {pipeline_mode = #tpu.pipeline_mode<synchronous>, transform_indices = @transform_1, window_bounds = array<i64: 2, 16, 16>}, {pipeline_mode = #tpu.pipeline_mode<synchronous>, transform_indices = @transform_2, window_bounds = array<i64: 2, 1, 16>}, {transform_indices = @transform_3, window_bounds = array<i64: 1, 4, 2, 4, 16>}]} {
    %c0 = arith.constant 0 : index
    %c0_0 = arith.constant 0 : index
    %c0_1 = arith.constant 0 : index
    %0 = vector.load %arg1[%c0, %c0_0, %c0_1] : memref<1x16x16xbf16, #tpu.memory_space<vmem>>, vector<1x16x16xbf16>
    %1 = vector.shape_cast %0 : vector<1x16x16xbf16> to vector<16x16xbf16>
    %c0_2 = arith.constant 0 : index
    %c0_3 = arith.constant 0 : index
    %c0_4 = arith.constant 0 : index
    %2 = vector.load %arg2[%c0_2, %c0_3, %c0_4] : memref<2x16x16xbf16, #tpu.memory_space<vmem>>, vector<1x16x16xbf16>
    %3 = vector.shape_cast %2 : vector<1x16x16xbf16> to vector<16x16xbf16>
    %cst = arith.constant dense<0.000000e+00> : vector<16x16xf32>
    %4 = tpu.matmul %1, %3, %cst {dimension_numbers = #tpu.dot_dimension_numbers<[1], [0], [0], [1], [0, 0, 1, 1], [], []>} : vector<16x16xbf16>, vector<16x16xbf16>, vector<16x16xf32> -> vector<16x16xf32>
    %c0_5 = arith.constant 0 : index
    %c0_6 = arith.constant 0 : index
    %c0_7 = arith.constant 0 : index
    %5 = vector.load %arg3[%c0_5, %c0_6, %c0_7] : memref<2x1x16xf32, #tpu.memory_space<vmem>>, vector<1x1x16xf32>
    %6 = vector.shape_cast %5 : vector<1x1x16xf32> to vector<1x16xf32>
    %7 = vector.broadcast %6 : vector<1x16xf32> to vector<16x16xf32>
    %8 = arith.addf %4, %7 : vector<16x16xf32>
    %cst_8 = arith.constant 0.000000e+00 : f32
    %9 = vector.broadcast %cst_8 : f32 to vector<16x16xf32>
    %10 = arith.maximumf %8, %9 : vector<16x16xf32>
    %11 = vector.shape_cast %10 : vector<16x16xf32> to vector<4x4x16xf32>
    %12 = arith.truncf %11 : vector<4x4x16xf32> to vector<4x4x16xbf16>
    %c0_9 = arith.constant 0 : index
    %c0_10 = arith.constant 0 : index
    %c0_11 = arith.constant 0 : index
    %c0_12 = arith.constant 0 : index
    %c0_13 = arith.constant 0 : index
    %13 = vector.load %arg4[%c0_9, %c0_10, %c0_11, %c0_12, %c0_13] : memref<1x4x2x4x16xbf16, #tpu.memory_space<vmem>>, vector<1x4x1x4x16xbf16>
    %14 = vector.shape_cast %13 : vector<1x4x1x4x16xbf16> to vector<4x4x16xbf16>
    %15 = vector.shape_cast %12 : vector<4x4x16xbf16> to vector<1x4x1x4x16xbf16>
    tpu.vector_store %arg4[%c0_9, %c0_10, %c0_11, %c0_12, %c0_13], %15 {strides = array<i32>} : memref<1x4x2x4x16xbf16, #tpu.memory_space<vmem>>, vector<1x4x1x4x16xbf16>,
    %c1 = arith.constant 1 : index
    %c0_14 = arith.constant 0 : index
    %c0_15 = arith.constant 0 : index
    %16 = vector.load %arg2[%c1, %c0_14, %c0_15] : memref<2x16x16xbf16, #tpu.memory_space<vmem>>, vector<1x16x16xbf16>
    %17 = vector.shape_cast %16 : vector<1x16x16xbf16> to vector<16x16xbf16>
    %cst_16 = arith.constant dense<0.000000e+00> : vector<16x16xf32>
    %18 = tpu.matmul %1, %17, %cst_16 {dimension_numbers = #tpu.dot_dimension_numbers<[1], [0], [0], [1], [0, 0, 1, 1], [], []>} : vector<16x16xbf16>, vector<16x16xbf16>, vector<16x16xf32> -> vector<16x16xf32>
    %c1_17 = arith.constant 1 : index
    %c0_18 = arith.constant 0 : index
    %c0_19 = arith.constant 0 : index
    %19 = vector.load %arg3[%c1_17, %c0_18, %c0_19] : memref<2x1x16xf32, #tpu.memory_space<vmem>>, vector<1x1x16xf32>
    %20 = vector.shape_cast %19 : vector<1x1x16xf32> to vector<1x16xf32>
    %21 = vector.broadcast %20 : vector<1x16xf32> to vector<16x16xf32>
    %22 = arith.addf %18, %21 : vector<16x16xf32>
    %cst_20 = arith.constant 0.000000e+00 : f32
    %23 = vector.broadcast %cst_20 : f32 to vector<16x16xf32>
    %24 = arith.maximumf %22, %23 : vector<16x16xf32>
    %25 = vector.shape_cast %24 : vector<16x16xf32> to vector<4x4x16xf32>
    %26 = arith.truncf %25 : vector<4x4x16xf32> to vector<4x4x16xbf16>
    %c0_21 = arith.constant 0 : index
    %c0_22 = arith.constant 0 : index
    %c1_23 = arith.constant 1 : index
    %c0_24 = arith.constant 0 : index
    %c0_25 = arith.constant 0 : index
    %27 = vector.load %arg4[%c0_21, %c0_22, %c1_23, %c0_24, %c0_25] : memref<1x4x2x4x16xbf16, #tpu.memory_space<vmem>>, vector<1x4x1x4x16xbf16>
    %28 = vector.shape_cast %27 : vector<1x4x1x4x16xbf16> to vector<4x4x16xbf16>
    %29 = vector.shape_cast %26 : vector<4x4x16xbf16> to vector<1x4x1x4x16xbf16>
    tpu.vector_store %arg4[%c0_21, %c0_22, %c1_23, %c0_24, %c0_25], %29 {strides = array<i32>} : memref<1x4x2x4x16xbf16, #tpu.memory_space<vmem>>, vector<1x4x1x4x16xbf16>,
    return
  }
  func.func @transform_0(%arg0: i32) -> (i32, i32, i32) {
    %c0_i32 = arith.constant 0 : i32
    %c0_i32_0 = arith.constant 0 : i32
    %c0_i32_1 = arith.constant 0 : i32
    return %arg0, %c0_i32, %c0_i32_0 : i32, i32, i32
  }
  func.func @transform_1(%arg0: i32) -> (i32, i32, i32) {
    %c0_i32 = arith.constant 0 : i32
    %c0_i32_0 = arith.constant 0 : i32
    %c0_i32_1 = arith.constant 0 : i32
    %c0_i32_2 = arith.constant 0 : i32
    return %c0_i32, %c0_i32_0, %c0_i32_1 : i32, i32, i32
  }
  func.func @transform_2(%arg0: i32) -> (i32, i32, i32) {
    %c0_i32 = arith.constant 0 : i32
    %c0_i32_0 = arith.constant 0 : i32
    %c0_i32_1 = arith.constant 0 : i32
    %c0_i32_2 = arith.constant 0 : i32
    return %c0_i32, %c0_i32_0, %c0_i32_1 : i32, i32, i32
  }
  func.func @transform_3(%arg0: i32) -> (i32, i32, i32, i32, i32) {
    %c0_i32 = arith.constant 0 : i32
    %c0_i32_0 = arith.constant 0 : i32
    %c0_i32_1 = arith.constant 0 : i32
    %c0_i32_2 = arith.constant 0 : i32
    %c0_i32_3 = arith.constant 0 : i32
    return %arg0, %c0_i32, %c0_i32_0, %c0_i32_1, %c0_i32_2 : i32, i32, i32, i32, i32
  }
}

module attributes {stable_mosaic.version = 11 : i64} {
  func.func @_dec_add_kernel(%arg0: i32, %arg1: memref<1x64x8xbf16, #tpu.memory_space<vmem>>, %arg2: memref<1x64x8xbf16, #tpu.memory_space<vmem>>, %arg3: memref<2x8x8xbf16, #tpu.memory_space<vmem>>, %arg4: memref<2x1x8xf32, #tpu.memory_space<vmem>>, %arg5: memref<1x8x2x8x8xbf16, #tpu.memory_space<vmem>>) attributes {dimension_semantics = [#tpu.dimension_semantics<parallel>], iteration_bounds = array<i64: 2>, scalar_prefetch = 0 : i64, scratch_operands = 0 : i64, tpu.core_type = #tpu.core_type<tc>, window_params = [{transform_indices = @transform_0, window_bounds = array<i64: 1, 64, 8>}, {transform_indices = @transform_1, window_bounds = array<i64: 1, 64, 8>}, {pipeline_mode = #tpu.pipeline_mode<synchronous>, transform_indices = @transform_2, window_bounds = array<i64: 2, 8, 8>}, {pipeline_mode = #tpu.pipeline_mode<synchronous>, transform_indices = @transform_3, window_bounds = array<i64: 2, 1, 8>}, {transform_indices = @transform_4, window_bounds = array<i64: 1, 8, 2, 8, 8>}]} {
    %c0 = arith.constant 0 : index
    %c0_0 = arith.constant 0 : index
    %c0_1 = arith.constant 0 : index
    %0 = vector.load %arg1[%c0, %c0_0, %c0_1] : memref<1x64x8xbf16, #tpu.memory_space<vmem>>, vector<1x64x8xbf16>
    %1 = vector.shape_cast %0 : vector<1x64x8xbf16> to vector<64x8xbf16>
    %2 = arith.extf %1 : vector<64x8xbf16> to vector<64x8xf32>
    %c0_2 = arith.constant 0 : index
    %c0_3 = arith.constant 0 : index
    %c0_4 = arith.constant 0 : index
    %3 = vector.load %arg2[%c0_2, %c0_3, %c0_4] : memref<1x64x8xbf16, #tpu.memory_space<vmem>>, vector<1x64x8xbf16>
    %4 = vector.shape_cast %3 : vector<1x64x8xbf16> to vector<64x8xbf16>
    %5 = arith.extf %4 : vector<64x8xbf16> to vector<64x8xf32>
    %6 = arith.addf %2, %5 : vector<64x8xf32>
    %7 = arith.truncf %6 : vector<64x8xf32> to vector<64x8xbf16>
    %c0_5 = arith.constant 0 : index
    %c0_6 = arith.constant 0 : index
    %c0_7 = arith.constant 0 : index
    %8 = vector.load %arg3[%c0_5, %c0_6, %c0_7] : memref<2x8x8xbf16, #tpu.memory_space<vmem>>, vector<1x8x8xbf16>
    %9 = vector.shape_cast %8 : vector<1x8x8xbf16> to vector<8x8xbf16>
    %cst = arith.constant dense<0.000000e+00> : vector<64x8xf32>
    %10 = tpu.matmul %7, %9, %cst {dimension_numbers = #tpu.dot_dimension_numbers<[1], [0], [0], [1], [0, 0, 1, 1], [], []>} : vector<64x8xbf16>, vector<8x8xbf16>, vector<64x8xf32> -> vector<64x8xf32>
    %c0_8 = arith.constant 0 : index
    %c0_9 = arith.constant 0 : index
    %c0_10 = arith.constant 0 : index
    %11 = vector.load %arg4[%c0_8, %c0_9, %c0_10] : memref<2x1x8xf32, #tpu.memory_space<vmem>>, vector<1x1x8xf32>
    %12 = vector.shape_cast %11 : vector<1x1x8xf32> to vector<1x8xf32>
    %13 = vector.broadcast %12 : vector<1x8xf32> to vector<64x8xf32>
    %14 = arith.addf %10, %13 : vector<64x8xf32>
    %cst_11 = arith.constant 0.000000e+00 : f32
    %15 = vector.broadcast %cst_11 : f32 to vector<64x8xf32>
    %16 = arith.maximumf %14, %15 : vector<64x8xf32>
    %17 = vector.shape_cast %16 : vector<64x8xf32> to vector<8x8x8xf32>
    %18 = arith.truncf %17 : vector<8x8x8xf32> to vector<8x8x8xbf16>
    %c0_12 = arith.constant 0 : index
    %c0_13 = arith.constant 0 : index
    %c0_14 = arith.constant 0 : index
    %c0_15 = arith.constant 0 : index
    %c0_16 = arith.constant 0 : index
    %19 = vector.load %arg5[%c0_12, %c0_13, %c0_14, %c0_15, %c0_16] : memref<1x8x2x8x8xbf16, #tpu.memory_space<vmem>>, vector<1x8x1x8x8xbf16>
    %20 = vector.shape_cast %19 : vector<1x8x1x8x8xbf16> to vector<8x8x8xbf16>
    %21 = vector.shape_cast %18 : vector<8x8x8xbf16> to vector<1x8x1x8x8xbf16>
    tpu.vector_store %arg5[%c0_12, %c0_13, %c0_14, %c0_15, %c0_16], %21 {strides = array<i32>} : memref<1x8x2x8x8xbf16, #tpu.memory_space<vmem>>, vector<1x8x1x8x8xbf16>,
    %c1 = arith.constant 1 : index
    %c0_17 = arith.constant 0 : index
    %c0_18 = arith.constant 0 : index
    %22 = vector.load %arg3[%c1, %c0_17, %c0_18] : memref<2x8x8xbf16, #tpu.memory_space<vmem>>, vector<1x8x8xbf16>
    %23 = vector.shape_cast %22 : vector<1x8x8xbf16> to vector<8x8xbf16>
    %cst_19 = arith.constant dense<0.000000e+00> : vector<64x8xf32>
    %24 = tpu.matmul %7, %23, %cst_19 {dimension_numbers = #tpu.dot_dimension_numbers<[1], [0], [0], [1], [0, 0, 1, 1], [], []>} : vector<64x8xbf16>, vector<8x8xbf16>, vector<64x8xf32> -> vector<64x8xf32>
    %c1_20 = arith.constant 1 : index
    %c0_21 = arith.constant 0 : index
    %c0_22 = arith.constant 0 : index
    %25 = vector.load %arg4[%c1_20, %c0_21, %c0_22] : memref<2x1x8xf32, #tpu.memory_space<vmem>>, vector<1x1x8xf32>
    %26 = vector.shape_cast %25 : vector<1x1x8xf32> to vector<1x8xf32>
    %27 = vector.broadcast %26 : vector<1x8xf32> to vector<64x8xf32>
    %28 = arith.addf %24, %27 : vector<64x8xf32>
    %cst_23 = arith.constant 0.000000e+00 : f32
    %29 = vector.broadcast %cst_23 : f32 to vector<64x8xf32>
    %30 = arith.maximumf %28, %29 : vector<64x8xf32>
    %31 = vector.shape_cast %30 : vector<64x8xf32> to vector<8x8x8xf32>
    %32 = arith.truncf %31 : vector<8x8x8xf32> to vector<8x8x8xbf16>
    %c0_24 = arith.constant 0 : index
    %c0_25 = arith.constant 0 : index
    %c1_26 = arith.constant 1 : index
    %c0_27 = arith.constant 0 : index
    %c0_28 = arith.constant 0 : index
    %33 = vector.load %arg5[%c0_24, %c0_25, %c1_26, %c0_27, %c0_28] : memref<1x8x2x8x8xbf16, #tpu.memory_space<vmem>>, vector<1x8x1x8x8xbf16>
    %34 = vector.shape_cast %33 : vector<1x8x1x8x8xbf16> to vector<8x8x8xbf16>
    %35 = vector.shape_cast %32 : vector<8x8x8xbf16> to vector<1x8x1x8x8xbf16>
    tpu.vector_store %arg5[%c0_24, %c0_25, %c1_26, %c0_27, %c0_28], %35 {strides = array<i32>} : memref<1x8x2x8x8xbf16, #tpu.memory_space<vmem>>, vector<1x8x1x8x8xbf16>,
    return
  }
  func.func @transform_0(%arg0: i32) -> (i32, i32, i32) {
    %c0_i32 = arith.constant 0 : i32
    %c0_i32_0 = arith.constant 0 : i32
    %c0_i32_1 = arith.constant 0 : i32
    return %arg0, %c0_i32, %c0_i32_0 : i32, i32, i32
  }
  func.func @transform_1(%arg0: i32) -> (i32, i32, i32) {
    %c0_i32 = arith.constant 0 : i32
    %c0_i32_0 = arith.constant 0 : i32
    %c0_i32_1 = arith.constant 0 : i32
    return %arg0, %c0_i32, %c0_i32_0 : i32, i32, i32
  }
  func.func @transform_2(%arg0: i32) -> (i32, i32, i32) {
    %c0_i32 = arith.constant 0 : i32
    %c0_i32_0 = arith.constant 0 : i32
    %c0_i32_1 = arith.constant 0 : i32
    %c0_i32_2 = arith.constant 0 : i32
    return %c0_i32, %c0_i32_0, %c0_i32_1 : i32, i32, i32
  }
  func.func @transform_3(%arg0: i32) -> (i32, i32, i32) {
    %c0_i32 = arith.constant 0 : i32
    %c0_i32_0 = arith.constant 0 : i32
    %c0_i32_1 = arith.constant 0 : i32
    %c0_i32_2 = arith.constant 0 : i32
    return %c0_i32, %c0_i32_0, %c0_i32_1 : i32, i32, i32
  }
  func.func @transform_4(%arg0: i32) -> (i32, i32, i32, i32, i32) {
    %c0_i32 = arith.constant 0 : i32
    %c0_i32_0 = arith.constant 0 : i32
    %c0_i32_1 = arith.constant 0 : i32
    %c0_i32_2 = arith.constant 0 : i32
    %c0_i32_3 = arith.constant 0 : i32
    return %arg0, %c0_i32, %c0_i32_0, %c0_i32_1, %c0_i32_2 : i32, i32, i32, i32, i32
  }
}

module attributes {stable_mosaic.version = 11 : i64} {
  func.func @_mm_add_kernel(%arg0: i32, %arg1: memref<256x4xbf16, #tpu.memory_space<vmem>>, %arg2: memref<256x4xf32, #tpu.memory_space<vmem>>, %arg3: memref<4x7xbf16, #tpu.memory_space<vmem>>, %arg4: memref<1x7xf32, #tpu.memory_space<vmem>>, %arg5: memref<256x7xf32, #tpu.memory_space<vmem>>) attributes {dimension_semantics = [#tpu.dimension_semantics<parallel>], iteration_bounds = array<i64: 2>, scalar_prefetch = 0 : i64, scratch_operands = 0 : i64, tpu.core_type = #tpu.core_type<tc>, window_params = [{transform_indices = @transform_0, window_bounds = array<i64: 256, 4>}, {transform_indices = @transform_1, window_bounds = array<i64: 256, 4>}, {pipeline_mode = #tpu.pipeline_mode<synchronous>, transform_indices = @transform_2, window_bounds = array<i64: 4, 7>}, {pipeline_mode = #tpu.pipeline_mode<synchronous>, transform_indices = @transform_3, window_bounds = array<i64: 1, 7>}, {transform_indices = @transform_4, window_bounds = array<i64: 256, 7>}]} {
    %c0 = arith.constant 0 : index
    %c0_0 = arith.constant 0 : index
    %0 = vector.load %arg1[%c0, %c0_0] : memref<256x4xbf16, #tpu.memory_space<vmem>>, vector<256x4xbf16>
    %1 = arith.extf %0 : vector<256x4xbf16> to vector<256x4xf32>
    %c0_1 = arith.constant 0 : index
    %c0_2 = arith.constant 0 : index
    %2 = vector.load %arg2[%c0_1, %c0_2] : memref<256x4xf32, #tpu.memory_space<vmem>>, vector<256x4xf32>
    %3 = arith.addf %1, %2 : vector<256x4xf32>
    %4 = arith.truncf %3 : vector<256x4xf32> to vector<256x4xbf16>
    %c0_3 = arith.constant 0 : index
    %c0_4 = arith.constant 0 : index
    %5 = vector.load %arg3[%c0_3, %c0_4] : memref<4x7xbf16, #tpu.memory_space<vmem>>, vector<4x7xbf16>
    %cst = arith.constant dense<0.000000e+00> : vector<256x7xf32>
    %6 = tpu.matmul %4, %5, %cst {dimension_numbers = #tpu.dot_dimension_numbers<[1], [0], [0], [1], [0, 0, 1, 1], [], []>} : vector<256x4xbf16>, vector<4x7xbf16>, vector<256x7xf32> -> vector<256x7xf32>
    %c0_5 = arith.constant 0 : index
    %c0_6 = arith.constant 0 : index
    %7 = vector.load %arg4[%c0_5, %c0_6] : memref<1x7xf32, #tpu.memory_space<vmem>>, vector<1x7xf32>
    %8 = vector.broadcast %7 : vector<1x7xf32> to vector<256x7xf32>
    %9 = arith.addf %6, %8 : vector<256x7xf32>
    %c0_7 = arith.constant 0 : index
    %c0_8 = arith.constant 0 : index
    %10 = vector.load %arg5[%c0_7, %c0_8] : memref<256x7xf32, #tpu.memory_space<vmem>>, vector<256x7xf32>
    tpu.vector_store %arg5[%c0_7, %c0_8], %9 {strides = array<i32>} : memref<256x7xf32, #tpu.memory_space<vmem>>, vector<256x7xf32>,
    return
  }
  func.func @transform_0(%arg0: i32) -> (i32, i32) {
    %c0_i32 = arith.constant 0 : i32
    %c0_i32_0 = arith.constant 0 : i32
    return %arg0, %c0_i32 : i32, i32
  }
  func.func @transform_1(%arg0: i32) -> (i32, i32) {
    %c0_i32 = arith.constant 0 : i32
    %c0_i32_0 = arith.constant 0 : i32
    return %arg0, %c0_i32 : i32, i32
  }
  func.func @transform_2(%arg0: i32) -> (i32, i32) {
    %c0_i32 = arith.constant 0 : i32
    %c0_i32_0 = arith.constant 0 : i32
    %c0_i32_1 = arith.constant 0 : i32
    return %c0_i32, %c0_i32_0 : i32, i32
  }
  func.func @transform_3(%arg0: i32) -> (i32, i32) {
    %c0_i32 = arith.constant 0 : i32
    %c0_i32_0 = arith.constant 0 : i32
    %c0_i32_1 = arith.constant 0 : i32
    return %c0_i32, %c0_i32_0 : i32, i32
  }
  func.func @transform_4(%arg0: i32) -> (i32, i32) {
    %c0_i32 = arith.constant 0 : i32
    %c0_i32_0 = arith.constant 0 : i32
    return %arg0, %c0_i32 : i32, i32
  }
}

</mosaic_0001>

<bundles_post_ra>
// kernel: _lambda_.7
= control target key start
LH: loop header
LB: loop body
LE: loop exit
PB: predicated region body
PF: predicated region fallthrough
CT: control target
= control target key end

     0   :  { %s401_s12 = smov 0   ;;  %s438_s0 = inlined_call_operand.vmem [shape: bf16[2,16,16], index: 0, kind: input, shape index: {}]   ;;  %s439_s1 = inlined_call_operand.vmem [shape: bf16[2,16,16], index: 1, kind: input, shape index: {}]   ;;  %s440_s2 = inlined_call_operand.vmem [shape: f32[2,1,16], index: 2, kind: input, shape index: {}]   ;;  %s441_s3 = inlined_call_operand.vmem [shape: bf16[2,4,2,4,16], index: 3, kind: output, shape index: {}]  }
   0x1 LB: > { %s326_s13 = sadd.s32 4294967295, %s379_s12   ;;  %p330_p0 = scmp.ge.s32.totalorder %s379_s12, 1  ;;  %s379_s12 = sphi %s401_s12, %s13_s12  }
   0x2   : > { %p137_p1 = scmp.lt.s32.totalorder %s379_s12, 3 }
   0x4   : > { %p138_p2 = pnand %p330_p0, %p137_p1 }
   0x5   : > { %p161_p3 = scmp.lt.s32.totalorder (!%p138_p2), %s326_s13, 1 }
   0x6   : > { %141 = sbr.rel (%p138_p2) target bundleno = 159 (0x9f), region = 32 }
   0xb   : > { %v361_v0 = vld [vmem:[%s439_s1] sm:$0xff]  ;;  %v362_v1 = vld [vmem:[%s439_s1 + $0x8] sm:$0xff]  ;;  %s443_s13 = smov (!%p161_p3, %s326_s13), 1  ;;  %vm191_vm0 = vcmask 130048   ;;  %vm221_vm1 = vcmask 123904  }
   0xc   : > { %202 = vmatpush.bf16.msra.mxu0 %v361_v0  ;;  %247 = vmatpush.bf16.msra.mxu1 %v362_v1  ;;  %s358_s18 = sshll.u32 %s443_s13, 3  ;;  %v371_v3 = vld [vmem:[%s440_s2] ss:$0 sm:$0xff]  ;;  %v372_v4 = vld [vmem:[%s440_s2 + $0x1] ss:$0 sm:$0xff]  ;;  %s359_s26 = sshll.u32 %s443_s13, 4 }
   0xd   : > { %s165_s21 = scalar_lea.vmem %s438_s0, %s358_s18  ;;  %s170_s29 = scalar_lea.vmem %s441_s3, %s359_s26 }
   0xe   : > { %v360_v2 = vld [vmem:[%s165_s21] sm:$0xff] }
   0xf   : > { %343 = vmatmul.msk.bf16.vlgmr.msra.gmra.mxu0 %vm191_vm0, %v360_v2  ;;  %351 = vmatmul.msk.bf16.vlgmr.msra.gmra.mxu1 %vm191_vm0, %v360_v2 }
  0x8c   : > { %v204_v5 = vpop.f32.mrf.mxu0  ;;  %v249_v6 = vpop.f32.mrf.mxu1 }
  0x8d   : > { %v205_v7 = vadd.f32 %v371_v3, %v204_v5  ;;  %v250_v8 = vadd.f32 %v372_v4, %v249_v6 }
  0x8f   : > { %v209_v9 = vmax.f32 %v205_v7, 0.0  ;;  %v254_v10 = vmax.f32 %v250_v8, 0.0 }
  0x91   : > { %v213_v11 = vrot.slane %v209_v9, 4  ;;  %v217_v12 = vpack.c.bf16 %v209_v9, %v209_v9  ;;  %v258_v13 = vrot.slane %v254_v10, 4  ;;  %v262_v14 = vpack.c.bf16 %v254_v10, %v254_v10 }
  0x93   : > { %v218_v15 = vpack.c.bf16 %v213_v11, %v213_v11  ;;  %222 = vst.msk [vmem:[%s170_s29] sm:$0x3] %vm221_vm1, %v217_v12  ;;  %v263_v16 = vpack.c.bf16 %v258_v13, %v258_v13 }
  0x94   : > { %352 = vst.msk [vmem:[%s170_s29 + $0x2] sm:$0x3] %vm221_vm1, %v262_v14  ;;  %v206_v17 = vpop.f32.mrf.mxu0  ;;  %v251_v18 = vpop.f32.mrf.mxu1 }
  0x95   : > { %223 = vst.msk [vmem:[%s170_s29 + $0x4] sm:$0x3] %vm221_vm1, %v218_v15  ;;  %v207_v19 = vadd.f32 %v371_v3, %v206_v17  ;;  %v252_v20 = vadd.f32 %v372_v4, %v251_v18 }
  0x96   : > { %353 = vst.msk [vmem:[%s170_s29 + $0x6] sm:$0x3] %vm221_vm1, %v263_v16 }
  0x97   : > { %v210_v21 = vmax.f32 %v207_v19, 0.0  ;;  %v255_v22 = vmax.f32 %v252_v20, 0.0 }
  0x99   : > { %v214_v23 = vrot.slane %v210_v21, 4  ;;  %v219_v24 = vpack.c.bf16 %v210_v21, %v210_v21  ;;  %v259_v25 = vrot.slane %v255_v22, 4  ;;  %v264_v26 = vpack.c.bf16 %v255_v22, %v255_v22 }
  0x9b   : > { %v220_v27 = vpack.c.bf16 %v214_v23, %v214_v23  ;;  %224 = vst.msk [vmem:[%s170_s29 + $0x8] sm:$0x3] %vm221_vm1, %v219_v24  ;;  %v265_v28 = vpack.c.bf16 %v259_v25, %v259_v25 }
  0x9c   : > { %354 = vst.msk [vmem:[%s170_s29 + $0xa] sm:$0x3] %vm221_vm1, %v264_v26 }
  0x9d   : > { %225 = vst.msk [vmem:[%s170_s29 + $0xc] sm:$0x3] %vm221_vm1, %v220_v27 }
  0x9e   : > { %355 = vst.msk [vmem:[%s170_s29 + $0xe] sm:$0x3] %vm221_vm1, %v265_v28 }
  0x9f PF: > { %s13_s12 = sadd.s32 1, %s379_s12  }
  0xa0   : > { %p10_p4 = scmp.ge.s32.totalorder %s13_s12, 4  }
  0xa2   :  { %12 = sbr.rel (!%p10_p4) target bundleno = 1 (0x1), region = 65 }

// kernel: _lambda_.6
= control target key start
LH: loop header
LB: loop body
LE: loop exit
PB: predicated region body
PF: predicated region fallthrough
CT: control target
= control target key end

     0   :  { %s897_s15 = smov 0   ;;  %s1025_s0 = inlined_call_operand.vmem [shape: bf16[2,5,2,5,16], index: 0, kind: input, shape index: {}]   ;;  %s1026_s1 = inlined_call_operand.vmem [shape: bf16[3,16,16], index: 1, kind: input, shape index: {}]   ;;  %s1027_s2 = inlined_call_operand.vmem [shape: bf16[3,16,16], index: 2, kind: input, shape index: {}]   ;;  %s1028_s3 = inlined_call_operand.vmem [shape: f32[1,16], index: 3, kind: input, shape index: {}]   ;;  %s1029_s4 = inlined_call_operand.vmem [shape: bf16[2,16,16], index: 4, kind: output, shape index: {}]  }
   0x1 LB: > { %s783_s16 = sadd.s32 4294967295, %s870_s15   ;;  %p787_p0 = scmp.ge.s32.totalorder %s870_s15, 1  ;;  %s870_s15 = sphi %s897_s15, %s14_s15  }
   0x2   : > { %p162_p1 = scmp.lt.s32.totalorder %s870_s15, 3 }
   0x4   : > { %p163_p2 = pnand %p787_p0, %p162_p1 }
   0x5   : > { %p188_p3 = scmp.lt.s32.totalorder (!%p163_p2), %s783_s16, 1 }
   0x6   : > { %166 = sbr.rel (%p163_p2) target bundleno = 240 (0xf0), region = 36 }
   0xb   : > { %v849_v0 = vld [vmem:[%s1027_s2] sm:$0xff]  ;;  %v850_v2 = vld [vmem:[%s1026_s1 + $0x8] sm:$0xff]  ;;  %s1033_s16 = smov (!%p188_p3, %s783_s16), 1  ;;  %vm215_vm0 = vcmask 1041408   ;;  %vm219_vm1 = vcmask 1043458   ;;  %v852_v60 = vld [vmem:[%s1026_s1 + $0x10] sm:$0xff] }
   0xc   : > { %v848_v1 = vld [vmem:[%s1026_s1] sm:$0xff]  ;;  %332 = vmatpush.bf16.msra.mxu0 %v849_v0  ;;  %496 = vmatpush.bf16.msra.mxu2 %v850_v2  ;;  %s854_s23 = smul.u32 40, %s1033_s16  ;;  %vm241_vm2 = vsmask.f32 1280  ;;  %vm242_vm3 = vsmask.f32 3336 }
   0xd   : > { %366 = vmatpush.bf16.msra.mxu1 %v848_v1  ;;  %vm244_vm4 = vsmask.f32 5392  ;;  %vm243_vm5 = vmor %vm241_vm2, %vm242_vm3  ;;  %vm246_vm7 = vsmask.f32 7448  ;;  %v851_v59 = vld [vmem:[%s1027_s2 + $0x8] sm:$0xff]  ;;  %vm322_vm9 = vcmask 130048  }
   0xe   : > { %s920_s26 = scalar_lea.vmem %s1025_s0, %s854_s23  ;;  %vm245_vm6 = vmor %vm243_vm5, %vm244_vm4  ;;  %535 = vmatpush.bf16.msra.mxu3 %v851_v59  ;;  %s847_s9 = sshll.u32 %s1033_s16, 3  ;;  %vm725_vm10 = vcmask 125952  }
   0xf   : > { %v203_v3 = vld [vmem:[%s920_s26] sm:$0x7]  ;;  %v204_v4 = vld [vmem:[%s920_s26 + $0x8] sm:$0x7]  ;;  %v205_v5 = vld [vmem:[%s920_s26 + $0x10] sm:$0x7]  ;;  %s197_s12 = scalar_lea.vmem %s1029_s4, %s847_s9 }
  0x10   : > { %v206_v6 = vld [vmem:[%s920_s26 + $0x18] sm:$0x7]  ;;  %v211_v7 = vrot.slane %v203_v3, 2  ;;  %v212_v8 = vrot.slane %v204_v4, 2  ;;  %v213_v9 = vrot.slane %v205_v5, 2  ;;  %vm936_vm8 = vmor %vm245_vm6, %vm246_vm7  ;;  %667 = vmatpush.bf16.msrb.mxu0 %v852_v60 }
  0x11   : > { %v214_v10 = vrot.slane %v206_v6, 2  ;;  %v805_v62 = vld [vmem:[%s920_s26 + $0x4] sm:$0x7]  ;;  %v806_v63 = vld [vmem:[%s920_s26 + $0xc] sm:$0x7] }
  0x12   : > { %v218_v11 = vsel %vm215_vm0, %v203_v3, %v211_v7  ;;  %v220_v12 = vsel %vm219_vm1, %v203_v3, %v211_v7  ;;  %v225_v13 = vsel %vm215_vm0, %v204_v4, %v212_v8  ;;  %v226_v14 = vsel %vm219_vm1, %v204_v4, %v212_v8  ;;  %v807_v0 = vld [vmem:[%s920_s26 + $0x14] sm:$0x7]  ;;  %v808_v1 = vld [vmem:[%s920_s26 + $0x1c] sm:$0x7]  ;;  %v199_v3 = vld [vmem:[%s920_s26] sm:$0x3] }
  0x13   : > { %v222_v15 = vrot.slane %v220_v12, 2  ;;  %v228_v16 = vrot.slane %v226_v14, 2  ;;  %v231_v17 = vsel %vm215_vm0, %v205_v5, %v213_v9  ;;  %v232_v18 = vsel %vm219_vm1, %v205_v5, %v213_v9  ;;  %v200_v5 = vld [vmem:[%s920_s26 + $0x8] sm:$0x3]  ;;  %v201_v8 = vld [vmem:[%s920_s26 + $0x10] sm:$0x3] }
  0x14   : > { %v234_v19 = vrot.slane %v232_v18, 2  ;;  %v237_v20 = vsel %vm215_vm0, %v206_v6, %v214_v10  ;;  %v238_v21 = vsel %vm219_vm1, %v206_v6, %v214_v10  ;;  %v248_v22 = vshrl.u32 %v218_v11, 16  ;;  %v202_v10 = vld [vmem:[%s920_s26 + $0x18] sm:$0x3]  ;;  %v828_v59 = vld [vmem:[%s920_s26 + $0x10] sm:$0x7] }
  0x15   : > { %v240_v23 = vrot.slane %v238_v21, 2  ;;  %v251_v24 = vshll.u32 %v218_v11, 16  ;;  %v257_v25 = vshll.u32 %v222_v15, 16  ;;  %v261_v26 = vshrl.u32 %v225_v13, 16 }
  0x16   : > { %v250_v27 = vrot.slane %v248_v22, 6  ;;  %v264_v28 = vshll.u32 %v225_v13, 16  ;;  %v270_v29 = vshll.u32 %v228_v16, 16  ;;  %v274_v30 = vshrl.u32 %v231_v17, 16  ;;  %v853_v13 = vld [vmem:[%s1027_s2 + $0x10] sm:$0xff] }
  0x17   : > { %v253_v31 = vrot.slane %v251_v24, 7  ;;  %v263_v32 = vrot.slane %v261_v26, 6  ;;  %v277_v33 = vshll.u32 %v231_v17, 16  ;;  %v259_v34 = vrot.slane %v257_v25, 7  ;;  %706 = vmatpush.bf16.msrb.mxu1 %v853_v13 }
  0x18   : > { %v266_v35 = vrot.slane %v264_v28, 7  ;;  %v276_v36 = vrot.slane %v274_v30, 6  ;;  %v283_v37 = vshll.u32 %v234_v19, 16  ;;  %v287_v40 = vshrl.u32 %v237_v20, 16 }
  0x19   : > { %v254_v38 = vor.u32 %v253_v31, %v250_v27  ;;  %v279_v39 = vrot.slane %v277_v33, 7  ;;  %v290_v41 = vshll.u32 %v237_v20, 16  ;;  %v272_v44 = vrot.slane %v270_v29, 7  ;;  %v801_v27 = vld [vmem:[%s920_s26 + $0x4] sm:$0x3] }
  0x1a   : > { %v267_v43 = vor.u32 %v266_v35, %v263_v32  ;;  %v285_v45 = vrot.slane %v283_v37, 7  ;;  %v296_v46 = vshll.u32 %v240_v23, 16  ;;  %v289_v49 = vrot.slane %v287_v40, 6  ;;  %v802_v32 = vld [vmem:[%s920_s26 + $0xc] sm:$0x3] }
  0x1b   : > { %v255_v47 = vrot.slane %v254_v38, 2  ;;  %v280_v48 = vor.u32 %v279_v39, %v276_v36  ;;  %v292_v50 = vrot.slane %v290_v41, 7  ;;  %v386_v2 = vrot.slane %v805_v62, 2  ;;  %v803_v36 = vld [vmem:[%s920_s26 + $0x14] sm:$0x3] }
  0x1c   : > { %v268_v51 = vrot.slane %v267_v43, 2  ;;  %v298_v55 = vrot.slane %v296_v46, 7  ;;  %v387_v4 = vrot.slane %v806_v63, 2  ;;  %v388_v6 = vrot.slane %v807_v0, 2 }
  0x1d   : > { %v260_v52 = vsel %vm936_vm8, %v255_v47, %v259_v34  ;;  %v281_v53 = vrot.slane %v280_v48, 2  ;;  %v293_v54 = vor.u32 %v292_v50, %v289_v49  ;;  %v389_v9 = vrot.slane %v808_v1, 2 }
  0x1e   : > { %v273_v56 = vsel %vm936_vm8, %v268_v51, %v272_v44  ;;  %305 = vst [vmem:[#allocation1] ss:$4 sm:$0xff] %v260_v52  ;;  %v392_v11 = vsel %vm215_vm0, %v805_v62, %v386_v2  ;;  %v398_v12 = vsel %vm215_vm0, %v806_v63, %v387_v4  ;;  %v404_v14 = vsel %vm215_vm0, %v807_v0, %v388_v6 }
  0x1f   : > { %v286_v57 = vsel %vm936_vm8, %v281_v53, %v285_v45  ;;  %v294_v58 = vrot.slane %v293_v54, 2  ;;  %308 = vst [vmem:[#allocation1 + $0x1] ss:$4 sm:$0xff] %v273_v56  ;;  %v410_v15 = vsel %vm215_vm0, %v808_v1, %v389_v9  ;;  %v414_v16 = vshrl.u32 %v392_v11, 16  ;;  %v804_v45 = vld [vmem:[%s920_s26 + $0x1c] sm:$0x3] }
  0x20   : > { %311 = vst [vmem:[#allocation1 + $0x2] ss:$4 sm:$0xff] %v286_v57  ;;  %v417_v17 = vshll.u32 %v392_v11, 16  ;;  %v393_v18 = vsel %vm219_vm1, %v805_v62, %v386_v2  ;;  %v427_v19 = vshrl.u32 %v398_v12, 16  ;;  %v430_v20 = vshll.u32 %v398_v12, 16 }
  0x21   : > { %v299_v61 = vsel %vm936_vm8, %v294_v58, %v298_v55  ;;  %v399_v21 = vsel %vm219_vm1, %v806_v63, %v387_v4  ;;  %v440_v22 = vshrl.u32 %v404_v14, 16  ;;  %v443_v23 = vshll.u32 %v404_v14, 16  ;;  %v827_v56 = vld [vmem:[%s920_s26 + $0x8] sm:$0x7]  ;;  %v829_v62 = vld [vmem:[%s920_s26 + $0x18] sm:$0x7] }
  0x22   : > { %314 = vst [vmem:[#allocation1 + $0x3] ss:$4 sm:$0xff] %v299_v61  ;;  %v405_v24 = vsel %vm219_vm1, %v807_v0, %v388_v6  ;;  %v453_v25 = vshrl.u32 %v410_v15, 16  ;;  %v456_v26 = vshll.u32 %v410_v15, 16  ;;  %v395_v28 = vrot.slane %v393_v18, 2 }
  0x23   : > { %v411_v29 = vsel %vm219_vm1, %v808_v1, %v389_v9  ;;  %v416_v30 = vrot.slane %v414_v16, 6  ;;  %v419_v31 = vrot.slane %v417_v17, 7  ;;  %v401_v33 = vrot.slane %v399_v21, 2  ;;  %v830_v1 = vld [vmem:[%s920_s26 + $0x20] sm:$0x7] }
  0x24   : > { %v429_v34 = vrot.slane %v427_v19, 6  ;;  %v432_v35 = vrot.slane %v430_v20, 7  ;;  %v407_v37 = vrot.slane %v405_v24, 2  ;;  %v442_v38 = vrot.slane %v440_v22, 6 }
  0x25   : > { %v445_v39 = vrot.slane %v443_v23, 7  ;;  %v413_v41 = vrot.slane %v411_v29, 2  ;;  %v455_v43 = vrot.slane %v453_v25, 6  ;;  %v458_v44 = vrot.slane %v456_v26, 7  ;;  %v823_v26 = vld [vmem:[%s920_s26 + $0x8] sm:$0x3] }
  0x26   : > { %v420_v46 = vor.u32 %v419_v31, %v416_v30  ;;  %v423_v47 = vshll.u32 %v395_v28, 16  ;;  %v433_v48 = vor.u32 %v432_v35, %v429_v34  ;;  %v436_v49 = vshll.u32 %v401_v33, 16  ;;  %v824_v31 = vld [vmem:[%s920_s26 + $0x10] sm:$0x3]  ;;  %v825_v35 = vld [vmem:[%s920_s26 + $0x18] sm:$0x3] }
  0x27   : > { %v446_v50 = vor.u32 %v445_v39, %v442_v38  ;;  %v449_v51 = vshll.u32 %v407_v37, 16  ;;  %v459_v52 = vor.u32 %v458_v44, %v455_v43  ;;  %v462_v53 = vshll.u32 %v413_v41, 16  ;;  %v826_v44 = vld [vmem:[%s920_s26 + $0x20] sm:$0x3] }
  0x28   : > { %v421_v54 = vrot.slane %v420_v46, 2  ;;  %v425_v55 = vrot.slane %v423_v47, 7  ;;  %v434_v57 = vrot.slane %v433_v48, 2  ;;  %v438_v58 = vrot.slane %v436_v49, 7 }
  0x29   : > { %v315_v7 = vld.sshfl [vmem:[#allocation1] sm:$0xff pattern:$0x73625140]  ;;  %v447_v60 = vrot.slane %v446_v50, 2  ;;  %v451_v61 = vrot.slane %v449_v51, 7  ;;  %v460_v63 = vrot.slane %v459_v52, 2 }
  0x2a   : > { %795 = vmatmul.msk.bf16.vlgmr.msra.gmra.mxu0 %vm322_vm9, %v315_v7  ;;  %340 = vst [vmem:[#allocation1] ss:$4 sm:$0xff] %v199_v3  ;;  %v464_v0 = vrot.slane %v462_v53, 7  ;;  %v557_v2 = vrot.slane %v827_v56, 2  ;;  %v426_v3 = vsel %vm936_vm8, %v421_v54, %v425_v55  ;;  %v558_v4 = vrot.slane %v828_v59, 2 }
  0x2b   : > { %343 = vst [vmem:[#allocation1 + $0x1] ss:$4 sm:$0xff] %v200_v5  ;;  %v439_v5 = vsel %vm936_vm8, %v434_v57, %v438_v58  ;;  %v559_v6 = vrot.slane %v829_v62, 2  ;;  %v560_v9 = vrot.slane %v830_v1, 2 }
  0x2c   : > { %346 = vst [vmem:[#allocation1 + $0x2] ss:$4 sm:$0xff] %v201_v8  ;;  %v452_v8 = vsel %vm936_vm8, %v447_v60, %v451_v61  ;;  %v563_v11 = vsel %vm215_vm0, %v827_v56, %v557_v2  ;;  %v569_v12 = vsel %vm215_vm0, %v828_v59, %v558_v4  ;;  %v564_v17 = vsel %vm219_vm1, %v827_v56, %v557_v2 }
  0x2d   : > { %349 = vst [vmem:[#allocation1 + $0x3] ss:$4 sm:$0xff] %v202_v10  ;;  %v465_v10 = vsel %vm936_vm8, %v460_v63, %v464_v0  ;;  %v575_v13 = vsel %vm215_vm0, %v829_v62, %v559_v6  ;;  %v581_v14 = vsel %vm215_vm0, %v830_v1, %v560_v9  ;;  %v585_v15 = vshrl.u32 %v563_v11, 16 }
  0x2e   : > { %v588_v16 = vshll.u32 %v563_v11, 16  ;;  %v598_v18 = vshrl.u32 %v569_v12, 16  ;;  %v601_v19 = vshll.u32 %v569_v12, 16  ;;  %v570_v20 = vsel %vm219_vm1, %v828_v59, %v558_v4 }
  0x2f   : > { %v611_v21 = vshrl.u32 %v575_v13, 16  ;;  %v614_v22 = vshll.u32 %v575_v13, 16  ;;  %v576_v23 = vsel %vm219_vm1, %v829_v62, %v559_v6  ;;  %v624_v24 = vshrl.u32 %v581_v14, 16 }
  0x30   : > { %v627_v25 = vshll.u32 %v581_v14, 16  ;;  %v582_v28 = vsel %vm219_vm1, %v830_v1, %v560_v9  ;;  %v587_v29 = vrot.slane %v585_v15, 6  ;;  %v590_v30 = vrot.slane %v588_v16, 7  ;;  %v863_v15 = vld [vmem:[%s1028_s3] ss:$0 sm:$0xff] }
  0x31   : > { %v600_v33 = vrot.slane %v598_v18, 6  ;;  %v603_v34 = vrot.slane %v601_v19, 7  ;;  %v613_v37 = vrot.slane %v611_v21, 6  ;;  %v616_v38 = vrot.slane %v614_v22, 7 }
  0x32   : > { %v626_v41 = vrot.slane %v624_v24, 6  ;;  %v629_v43 = vrot.slane %v627_v25, 7 }
  0x33   : > { %v604_v47 = vor.u32 %v603_v34, %v600_v33  ;;  %v617_v49 = vor.u32 %v616_v38, %v613_v37 }
  0x34   : > { %v350_v40 = vld.sshfl [vmem:[#allocation1] sm:$0xff pattern:$0x73625140]  ;;  %v630_v51 = vor.u32 %v629_v43, %v626_v41 }
  0x35   : > { %800 = vmatmul.msk.bf16.vlgmr.msra.gmra.mxu1 %vm322_vm9, %v350_v40  ;;  %470 = vst [vmem:[#allocation1] ss:$4 sm:$0xff] %v801_v27  ;;  %v566_v27 = vrot.slane %v564_v17, 2  ;;  %v584_v40 = vrot.slane %v582_v28, 2  ;;  %v605_v55 = vrot.slane %v604_v47, 2  ;;  %v618_v57 = vrot.slane %v617_v49, 2 }
  0x36   : > { %473 = vst [vmem:[#allocation1 + $0x1] ss:$4 sm:$0xff] %v802_v32  ;;  %v572_v32 = vrot.slane %v570_v20, 2  ;;  %v631_v59 = vrot.slane %v630_v51, 2 }
  0x37   : > { %476 = vst [vmem:[#allocation1 + $0x2] ss:$4 sm:$0xff] %v803_v36  ;;  %v578_v36 = vrot.slane %v576_v23, 2  ;;  %v594_v46 = vshll.u32 %v566_v27, 16  ;;  %v633_v52 = vshll.u32 %v584_v40, 16 }
  0x38   : > { %479 = vst [vmem:[#allocation1 + $0x3] ss:$4 sm:$0xff] %v804_v45  ;;  %v591_v45 = vor.u32 %v590_v30, %v587_v29  ;;  %v607_v48 = vshll.u32 %v572_v32, 16 }
  0x39   : > { %v620_v50 = vshll.u32 %v578_v36, 16  ;;  %v596_v54 = vrot.slane %v594_v46, 7  ;;  %v635_v60 = vrot.slane %v633_v52, 7 }
  0x3a   : > { %v592_v53 = vrot.slane %v591_v45, 2  ;;  %v609_v56 = vrot.slane %v607_v48, 7 }
  0x3b   : > { %v622_v58 = vrot.slane %v620_v50, 7  ;;  %v636_v1 = vsel %vm936_vm8, %v631_v59, %v635_v60 }
  0x3c   : > { %v597_v61 = vsel %vm936_vm8, %v592_v53, %v596_v54  ;;  %v610_v62 = vsel %vm936_vm8, %v605_v55, %v609_v56 }
  0x3d   : > { %v623_v63 = vsel %vm936_vm8, %v618_v57, %v622_v58 }
  0x3f   : > { %v480_v7 = vld.sshfl [vmem:[#allocation1] sm:$0xff pattern:$0x73625140] }
  0x40   : > { %815 = vmatmul.msk.bf16.vlgmr.msra.gmra.mxu2 %vm322_vm9, %v480_v7  ;;  %509 = vst [vmem:[#allocation1] ss:$4 sm:$0xff] %v426_v3 }
  0x41   : > { %512 = vst [vmem:[#allocation1 + $0x1] ss:$4 sm:$0xff] %v439_v5 }
  0x42   : > { %515 = vst [vmem:[#allocation1 + $0x2] ss:$4 sm:$0xff] %v452_v8 }
  0x43   : > { %518 = vst [vmem:[#allocation1 + $0x3] ss:$4 sm:$0xff] %v465_v10 }
  0x4a   : > { %v519_v39 = vld.sshfl [vmem:[#allocation1] sm:$0xff pattern:$0x73625140] }
  0x4b   : > { %822 = vmatmul.msk.bf16.vlgmr.msra.gmra.mxu3 %vm322_vm9, %v519_v39  ;;  %641 = vst [vmem:[#allocation1] ss:$4 sm:$0xff] %v823_v26 }
  0x4c   : > { %644 = vst [vmem:[#allocation1 + $0x1] ss:$4 sm:$0xff] %v824_v31 }
  0x4d   : > { %647 = vst [vmem:[#allocation1 + $0x2] ss:$4 sm:$0xff] %v825_v35 }
  0x4e   : > { %650 = vst [vmem:[#allocation1 + $0x3] ss:$4 sm:$0xff] %v826_v44 }
  0x55   : > { %v651_v0 = vld.sshfl [vmem:[#allocation1] sm:$0xff pattern:$0x73625140] }
  0x56   : > { %837 = vmatmul.msk.bf16.vlgmr.msrb.gmra.mxu0 %vm322_vm9, %v651_v0  ;;  %680 = vst [vmem:[#allocation1] ss:$4 sm:$0xff] %v597_v61 }
  0x57   : > { %683 = vst [vmem:[#allocation1 + $0x1] ss:$4 sm:$0xff] %v610_v62 }
  0x58   : > { %686 = vst [vmem:[#allocation1 + $0x2] ss:$4 sm:$0xff] %v623_v63 }
  0x59   : > { %689 = vst [vmem:[#allocation1 + $0x3] ss:$4 sm:$0xff] %v636_v1 }
  0x60   : > { %v690_v2 = vld.sshfl [vmem:[#allocation1] sm:$0xff pattern:$0x73625140] }
  0x61   : > { %844 = vmatmul.msk.bf16.vlgmr.msrb.gmra.mxu1 %vm322_vm9, %v690_v2 }
  0xa7   : > { %v334_v3 = vpop.f32.mrf.mxu0 }
  0xaf   : > { %v336_v5 = vpop.f32.mrf.mxu0 }
  0xb2   : > { %v368_v4 = vpop.f32.mrf.mxu1 }
  0xb3   : > { %v369_v7 = vadd.f32 %v368_v4, %v334_v3 }
  0xba   : > { %v370_v9 = vpop.f32.mrf.mxu1 }
  0xbb   : > { %v371_v13 = vadd.f32 %v370_v9, %v336_v5 }
  0xc3   : > { %v498_v6 = vpop.f32.mrf.mxu2 }
  0xc4   : > { %v503_v10 = vadd.f32 %v498_v6, %v369_v7 }
  0xcb   : > { %v500_v12 = vpop.f32.mrf.mxu2 }
  0xcc   : > { %v504_v18 = vadd.f32 %v500_v12, %v371_v13 }
  0xce   : > { %v537_v8 = vpop.f32.mrf.mxu3 }
  0xcf   : > { %v542_v11 = vadd.f32 %v537_v8, %v503_v10 }
  0xd3   : > { %v669_v42 = vpop.f32.mrf.mxu0 }
  0xd4   : > { %v674_v14 = vadd.f32 %v669_v42, %v542_v11 }
  0xd6   : > { %v539_v16 = vpop.f32.mrf.mxu3 }
  0xd7   : > { %v543_v20 = vadd.f32 %v539_v16, %v504_v18 }
  0xdb   : > { %v671_v22 = vpop.f32.mrf.mxu0 }
  0xdc   : > { %v675_v24 = vadd.f32 %v671_v22, %v543_v20 }
  0xde   : > { %v708_v17 = vpop.f32.mrf.mxu1 }
  0xdf   : > { %v713_v19 = vadd.f32 %v708_v17, %v674_v14 }
  0xe1   : > { %v719_v21 = vadd.f32 %v863_v15, %v713_v19 }
  0xe3   : > { %v721_v23 = vmax.f32 %v719_v21, 0.0 }
  0xe5   : > { %v723_v25 = vpack.c.bf16 %v721_v23, %v721_v23 }
  0xe6   : > { %v710_v26 = vpop.f32.mrf.mxu1 }
  0xe7   : > { %726 = vst.msk [vmem:[%s197_s12] sm:$0xf] %vm725_vm10, %v723_v25  ;;  %v714_v27 = vadd.f32 %v710_v26, %v675_v24 }
  0xe9   : > { %v720_v28 = vadd.f32 %v863_v15, %v714_v27 }
  0xeb   : > { %v722_v29 = vmax.f32 %v720_v28, 0.0 }
  0xed   : > { %v724_v30 = vpack.c.bf16 %v722_v29, %v722_v29 }
  0xef   : > { %727 = vst.msk [vmem:[%s197_s12 + $0x4] sm:$0xf] %vm725_vm10, %v724_v30 }
  0xf0 PF: > { %s14_s15 = sadd.s32 1, %s870_s15  }
  0xf1   : > { %p11_p4 = scmp.ge.s32.totalorder %s14_s15, 4  }
  0xf3   :  { %13 = sbr.rel (!%p11_p4) target bundleno = 1 (0x1), region = 90 }

// kernel: _lambda_.8
= control target key start
LH: loop header
LB: loop body
LE: loop exit
PB: predicated region body
PF: predicated region fallthrough
CT: control target
= control target key end

     0   :  { %s587_s15 = smov 0   ;;  %s685_s0 = inlined_call_operand.vmem [shape: bf16[2,64,8], index: 0, kind: input, shape index: {}]   ;;  %s686_s1 = inlined_call_operand.vmem [shape: bf16[2,64,8], index: 1, kind: input, shape index: {}]   ;;  %s687_s2 = inlined_call_operand.vmem [shape: bf16[2,8,8], index: 2, kind: input, shape index: {}]   ;;  %s688_s3 = inlined_call_operand.vmem [shape: f32[2,1,8], index: 3, kind: input, shape index: {}]   ;;  %s689_s4 = inlined_call_operand.vmem [shape: bf16[2,8,2,8,8], index: 4, kind: output, shape index: {}]  }
   0x1 LB: > { %s470_s16 = sadd.s32 4294967295, %s560_s15   ;;  %p474_p0 = scmp.ge.s32.totalorder %s560_s15, 1  ;;  %s560_s15 = sphi %s587_s15, %s14_s15  }
   0x2   : > { %p172_p1 = scmp.lt.s32.totalorder %s560_s15, 3 }
   0x4   : > { %p173_p2 = pnand %p474_p0, %p172_p1 }
   0x5   : > { %p203_p3 = scmp.lt.s32.totalorder (!%p173_p2), %s470_s16, 1 }
   0x6   : > { %176 = sbr.rel (%p173_p2) target bundleno = 187 (0xbb), region = 36 }
   0xb   : > { %v263_v0 = vld [vmem:[%s687_s2] sm:$0xf]  ;;  %vm281_vm0 = vcmask 1043456   ;;  %v485_v1 = vld [vmem:[%s687_s2 + $0x4] sm:$0xf]  ;;  %s691_s16 = smov (!%p203_p3, %s470_s16), 1 }
   0xc   : > { %v283_v2 = vsel %vm281_vm0, %v263_v0, 0  ;;  %v347_v3 = vsel %vm281_vm0, %v485_v1, 0  ;;  %s501_s21 = sshll.u32 %s691_s16, 5  ;;  %vm268_vm1 = vcmask 64512   ;;  %v621_v40 = vld [vmem:[%s688_s3] ss:$0 sm:$0xff] }
   0xd   : > { %292 = vmatpush.bf16.msra.mxu0 %v283_v2  ;;  %542 = vmatpush.bf16.msra.mxu2 %v283_v2  ;;  %s207_s24 = scalar_lea.vmem %s685_s0, %s501_s21  ;;  %s212_s27 = scalar_lea.vmem %s686_s1, %s501_s21  ;;  %v626_v41 = vld [vmem:[%s688_s3 + $0x1] ss:$0 sm:$0xff]  ;;  %vm330_vm2 = vcmask 60416  }
   0xe   : > { %356 = vmatpush.bf16.msra.mxu1 %v347_v3  ;;  %543 = vmatpush.bf16.msra.mxu3 %v347_v3  ;;  %v505_v4 = vld [vmem:[%s207_s24] sm:$0xff]   ;;  %v537_v6 = vld [vmem:[%s207_s24 + $0x10] sm:$0xff]   ;;  %v536_v22 = vld [vmem:[%s207_s24 + $0x8] sm:$0xff]   ;;  %s503_s6 = sshll.u32 %s691_s16, 6 }
   0xf   : > { %v521_v5 = vld [vmem:[%s212_s27] sm:$0xff]   ;;  %v506_v7 = vunpack.c.l.bf16 %v505_v4  ;;  %v507_v8 = vunpack.c.h.bf16 %v505_v4  ;;  %v540_v11 = vld [vmem:[%s212_s27 + $0x10] sm:$0xff]   ;;  %v514_v12 = vunpack.c.l.bf16 %v537_v6  ;;  %v515_v13 = vunpack.c.h.bf16 %v537_v6  ;;  %v539_v23 = vld [vmem:[%s212_s27 + $0x8] sm:$0xff]   ;;  %s634_s9 = scalar_lea.vmem %s689_s4, %s503_s6 }
  0x10   : > { %v522_v9 = vunpack.c.l.bf16 %v521_v5  ;;  %v523_v10 = vunpack.c.h.bf16 %v521_v5  ;;  %v530_v14 = vunpack.c.l.bf16 %v540_v11  ;;  %v531_v15 = vunpack.c.h.bf16 %v540_v11  ;;  %v538_v24 = vld [vmem:[%s207_s24 + $0x18] sm:$0xff]  }
  0x11   : > { %v541_v25 = vld [vmem:[%s212_s27 + $0x18] sm:$0xff]   ;;  %v510_v26 = vunpack.c.l.bf16 %v536_v22  ;;  %v511_v27 = vunpack.c.h.bf16 %v536_v22  ;;  %v526_v28 = vunpack.c.l.bf16 %v539_v23  ;;  %v527_v29 = vunpack.c.h.bf16 %v539_v23 }
  0x12   : > { %v251_v16 = vadd.f32 %v522_v9, %v506_v7  ;;  %v252_v17 = vadd.f32 %v523_v10, %v507_v8  ;;  %v255_v18 = vadd.f32 %v530_v14, %v514_v12  ;;  %v256_v19 = vadd.f32 %v531_v15, %v515_v13 }
  0x13   : > { %v518_v30 = vunpack.c.l.bf16 %v538_v24  ;;  %v519_v31 = vunpack.c.h.bf16 %v538_v24  ;;  %v534_v32 = vunpack.c.l.bf16 %v541_v25  ;;  %v535_v33 = vunpack.c.h.bf16 %v541_v25 }
  0x14   : > { %v259_v20 = vpack.c.bf16 %v252_v17, %v251_v16  ;;  %v261_v21 = vpack.c.bf16 %v256_v19, %v255_v18  ;;  %v253_v34 = vadd.f32 %v526_v28, %v510_v26  ;;  %v254_v35 = vadd.f32 %v527_v29, %v511_v27 }
  0x15   : > { %v257_v36 = vadd.f32 %v534_v32, %v518_v30  ;;  %v258_v37 = vadd.f32 %v535_v33, %v519_v31 }
  0x16   : > { %481 = vmatmul.msk.bf16.vlgmr.msra.gmra.mxu0 %vm268_vm1, %v259_v20  ;;  %487 = vmatmul.msk.bf16.vlgmr.msra.gmra.mxu1 %vm268_vm1, %v259_v20  ;;  %v260_v38 = vpack.c.bf16 %v254_v35, %v253_v34 }
  0x17   : > { %483 = vmatmul.msk.bf16.vlgmr.msra.gmra.mxu2 %vm268_vm1, %v261_v21  ;;  %489 = vmatmul.msk.bf16.vlgmr.msra.gmra.mxu3 %vm268_vm1, %v261_v21  ;;  %v262_v39 = vpack.c.bf16 %v258_v37, %v257_v36 }
  0x26   : > { %482 = vmatmul.msk.bf16.gmra.mxu0 %vm268_vm1, %v260_v38  ;;  %488 = vmatmul.msk.bf16.gmra.mxu1 %vm268_vm1, %v260_v38 }
  0x27   : > { %484 = vmatmul.msk.bf16.gmra.mxu2 %vm268_vm1, %v262_v39  ;;  %490 = vmatmul.msk.bf16.gmra.mxu3 %vm268_vm1, %v262_v39 }
  0x93   : > { %v294_v42 = vpop.f32.mrf.mxu0  ;;  %v358_v43 = vpop.f32.mrf.mxu1 }
  0x94   : > { %v295_v44 = vadd.f32 %v621_v40, %v294_v42  ;;  %v359_v45 = vadd.f32 %v626_v41, %v358_v43 }
  0x96   : > { %v314_v46 = vmax.f32 %v295_v44, 0.0  ;;  %v378_v47 = vmax.f32 %v359_v45, 0.0 }
  0x98   : > { %v322_v48 = vpack.c.bf16 %v314_v46, %v314_v46  ;;  %v386_v49 = vpack.c.bf16 %v378_v47, %v378_v47 }
  0x9a   : > { %331 = vst.msk [vmem:[%s634_s9] sm:$0xf] %vm330_vm2, %v322_v48  ;;  %v304_v50 = vpop.f32.mrf.mxu2  ;;  %v368_v51 = vpop.f32.mrf.mxu3 }
  0x9b   : > { %491 = vst.msk [vmem:[%s634_s9 + $0x4] sm:$0xf] %vm330_vm2, %v386_v49  ;;  %v305_v52 = vadd.f32 %v621_v40, %v304_v50  ;;  %v369_v53 = vadd.f32 %v626_v41, %v368_v51  ;;  %v296_v54 = vpop.f32.mrf.mxu0  ;;  %v360_v55 = vpop.f32.mrf.mxu1 }
  0x9c   : > { %v297_v56 = vadd.f32 %v621_v40, %v296_v54  ;;  %v361_v57 = vadd.f32 %v626_v41, %v360_v55 }
  0x9d   : > { %v318_v58 = vmax.f32 %v305_v52, 0.0  ;;  %v382_v59 = vmax.f32 %v369_v53, 0.0 }
  0x9e   : > { %v315_v60 = vmax.f32 %v297_v56, 0.0  ;;  %v379_v61 = vmax.f32 %v361_v57, 0.0 }
  0x9f   : > { %v326_v62 = vpack.c.bf16 %v318_v58, %v318_v58  ;;  %v390_v63 = vpack.c.bf16 %v382_v59, %v382_v59 }
  0xa0   : > { %v323_v0 = vpack.c.bf16 %v315_v60, %v315_v60  ;;  %v387_v1 = vpack.c.bf16 %v379_v61, %v379_v61 }
  0xa1   : > { %335 = vst.msk [vmem:[%s634_s9 + $0x20] sm:$0xf] %vm330_vm2, %v326_v62 }
  0xa2   : > { %495 = vst.msk [vmem:[%s634_s9 + $0x24] sm:$0xf] %vm330_vm2, %v390_v63  ;;  %v306_v2 = vpop.f32.mrf.mxu2  ;;  %v370_v3 = vpop.f32.mrf.mxu3 }
  0xa3   : > { %332 = vst.msk [vmem:[%s634_s9 + $0x8] sm:$0xf] %vm330_vm2, %v323_v0  ;;  %v307_v4 = vadd.f32 %v621_v40, %v306_v2  ;;  %v371_v5 = vadd.f32 %v626_v41, %v370_v3  ;;  %v299_v6 = vpop.f32.mrf.mxu0  ;;  %v363_v7 = vpop.f32.mrf.mxu1 }
  0xa4   : > { %492 = vst.msk [vmem:[%s634_s9 + $0xc] sm:$0xf] %vm330_vm2, %v387_v1  ;;  %v300_v8 = vadd.f32 %v621_v40, %v299_v6  ;;  %v364_v9 = vadd.f32 %v626_v41, %v363_v7 }
  0xa5   : > { %v319_v10 = vmax.f32 %v307_v4, 0.0  ;;  %v383_v11 = vmax.f32 %v371_v5, 0.0 }
  0xa6   : > { %v316_v12 = vmax.f32 %v300_v8, 0.0  ;;  %v380_v13 = vmax.f32 %v364_v9, 0.0 }
  0xa7   : > { %v327_v14 = vpack.c.bf16 %v319_v10, %v319_v10  ;;  %v391_v15 = vpack.c.bf16 %v383_v11, %v383_v11 }
  0xa8   : > { %v324_v16 = vpack.c.bf16 %v316_v12, %v316_v12  ;;  %v388_v17 = vpack.c.bf16 %v380_v13, %v380_v13 }
  0xa9   : > { %336 = vst.msk [vmem:[%s634_s9 + $0x28] sm:$0xf] %vm330_vm2, %v327_v14 }
  0xaa   : > { %496 = vst.msk [vmem:[%s634_s9 + $0x2c] sm:$0xf] %vm330_vm2, %v391_v15  ;;  %v309_v18 = vpop.f32.mrf.mxu2  ;;  %v373_v19 = vpop.f32.mrf.mxu3 }
  0xab   : > { %333 = vst.msk [vmem:[%s634_s9 + $0x10] sm:$0xf] %vm330_vm2, %v324_v16  ;;  %v310_v20 = vadd.f32 %v621_v40, %v309_v18  ;;  %v374_v21 = vadd.f32 %v626_v41, %v373_v19  ;;  %v301_v22 = vpop.f32.mrf.mxu0  ;;  %v365_v23 = vpop.f32.mrf.mxu1 }
  0xac   : > { %493 = vst.msk [vmem:[%s634_s9 + $0x14] sm:$0xf] %vm330_vm2, %v388_v17  ;;  %v302_v24 = vadd.f32 %v621_v40, %v301_v22  ;;  %v366_v25 = vadd.f32 %v626_v41, %v365_v23 }
  0xad   : > { %v320_v26 = vmax.f32 %v310_v20, 0.0  ;;  %v384_v27 = vmax.f32 %v374_v21, 0.0 }
  0xae   : > { %v317_v28 = vmax.f32 %v302_v24, 0.0  ;;  %v381_v29 = vmax.f32 %v366_v25, 0.0 }
  0xaf   : > { %v328_v30 = vpack.c.bf16 %v320_v26, %v320_v26  ;;  %v392_v31 = vpack.c.bf16 %v384_v27, %v384_v27 }
  0xb0   : > { %v325_v32 = vpack.c.bf16 %v317_v28, %v317_v28  ;;  %v389_v33 = vpack.c.bf16 %v381_v29, %v381_v29 }
  0xb1   : > { %337 = vst.msk [vmem:[%s634_s9 + $0x30] sm:$0xf] %vm330_vm2, %v328_v30 }
  0xb2   : > { %497 = vst.msk [vmem:[%s634_s9 + $0x34] sm:$0xf] %vm330_vm2, %v392_v31  ;;  %v311_v34 = vpop.f32.mrf.mxu2  ;;  %v375_v35 = vpop.f32.mrf.mxu3 }
  0xb3   : > { %334 = vst.msk [vmem:[%s634_s9 + $0x18] sm:$0xf] %vm330_vm2, %v325_v32  ;;  %v312_v36 = vadd.f32 %v621_v40, %v311_v34  ;;  %v376_v37 = vadd.f32 %v626_v41, %v375_v35 }
  0xb4   : > { %494 = vst.msk [vmem:[%s634_s9 + $0x1c] sm:$0xf] %vm330_vm2, %v389_v33 }
  0xb5   : > { %v321_v38 = vmax.f32 %v312_v36, 0.0  ;;  %v385_v39 = vmax.f32 %v376_v37, 0.0 }
  0xb7   : > { %v329_v42 = vpack.c.bf16 %v321_v38, %v321_v38  ;;  %v393_v43 = vpack.c.bf16 %v385_v39, %v385_v39 }
  0xb9   : > { %338 = vst.msk [vmem:[%s634_s9 + $0x38] sm:$0xf] %vm330_vm2, %v329_v42 }
  0xba   : > { %498 = vst.msk [vmem:[%s634_s9 + $0x3c] sm:$0xf] %vm330_vm2, %v393_v43 }
  0xbb PF: > { %s14_s15 = sadd.s32 1, %s560_s15  }
  0xbc   : > { %p11_p4 = scmp.ge.s32.totalorder %s14_s15, 4  }
  0xbe   :  { %13 = sbr.rel (!%p11_p4) target bundleno = 1 (0x1), region = 72 }

// kernel: _lambda_.5
= control target key start
LH: loop header
LB: loop body
LE: loop exit
PB: predicated region body
PF: predicated region fallthrough
CT: control target
= control target key end

     0   :  { %s1260_s15 = smov 0   ;;  %s1530_s0 = inlined_call_operand.vmem [shape: bf16[2,9,2,9,8], index: 0, kind: input, shape index: {}]   ;;  %s1531_s1 = inlined_call_operand.vmem [shape: bf16[3,8,8], index: 1, kind: input, shape index: {}]   ;;  %s1532_s2 = inlined_call_operand.vmem [shape: bf16[3,8,8], index: 2, kind: input, shape index: {}]   ;;  %s1533_s3 = inlined_call_operand.vmem [shape: f32[1,8], index: 3, kind: input, shape index: {}]   ;;  %s1534_s4 = inlined_call_operand.vmem [shape: bf16[2,64,8], index: 4, kind: output, shape index: {}]  }
   0x1 LB: > { %s1084_s16 = sadd.s32 4294967295, %s1233_s15   ;;  %p1088_p0 = scmp.ge.s32.totalorder %s1233_s15, 1  ;;  %s1233_s15 = sphi %s1260_s15, %s14_s15  }
   0x2   : > { %p162_p1 = scmp.lt.s32.totalorder %s1233_s15, 3 }
   0x4   : > { %p163_p2 = pnand %p1088_p0, %p162_p1 }
   0x5   : > { %p188_p3 = scmp.lt.s32.totalorder (!%p163_p2), %s1084_s16, 1 }
   0x6   : > { %166 = sbr.rel (%p163_p2) target bundleno = 267 (0x10b), region = 36 }
   0xb   : > { %v330_v0 = vld [vmem:[%s1531_s1] sm:$0xf]  ;;  %vm357_vm0 = vcmask 1043456   ;;  %s1538_s16 = smov (!%p188_p3, %s1084_s16), 1  ;;  %v1132_v4 = vld [vmem:[%s1531_s1 + $0x4] sm:$0xf] }
   0xc   : > { %v423_v1 = vsel %vm357_vm0, %v330_v0, 0  ;;  %v331_v2 = vld [vmem:[%s1532_s2] sm:$0xf]  ;;  %v618_v5 = vsel %vm357_vm0, %v1132_v4, 0  ;;  %v1153_v6 = vld [vmem:[%s1532_s2 + $0x4] sm:$0xf] }
   0xd   : > { %1216 = vmatpush.bf16.msra.mxu3 %v423_v1  ;;  %v359_v3 = vsel %vm357_vm0, %v331_v2, 0  ;;  %432 = vmatpush.bf16.msra.mxu1 %v423_v1  ;;  %v1174_v7 = vld [vmem:[%s1531_s1 + $0x8] sm:$0xf]  ;;  %s1217_s27 = smul.u32 144, %s1538_s16  ;;  %v684_v8 = vsel %vm357_vm0, %v1153_v6, 0  ;;  %vm344_vm1 = vcmask 64512  }
   0xe   : > { %1215 = vmatpush.bf16.msra.mxu2 %v359_v3  ;;  %368 = vmatpush.bf16.msra.mxu0 %v359_v3  ;;  %v887_v9 = vsel %vm357_vm0, %v1174_v7, 0  ;;  %v1195_v10 = vld [vmem:[%s1532_s2 + $0x8] sm:$0xf]  ;;  %vm215_vm2 = vsmask.f32 3328  ;;  %s1202_s9 = sshll.u32 %s1538_s16, 5 }
   0xf   : > { %v953_v11 = vsel %vm357_vm0, %v1195_v10, 0  ;;  %s1298_s6 = scalar_lea.vmem %s1530_s0, %s1217_s27  ;;  %vm216_vm3 = vsmask.f32 7440  ;;  %s1494_s12 = scalar_lea.vmem %s1534_s4, %s1202_s9  ;;  %vm1020_vm5 = vcmask 60416  }
  0x10   : > { %v1106_v12 = vld [vmem:[%s1298_s6 + $0x40] sm:$0xf]  ;;  %v1205_v13 = vld [vmem:[%s1298_s6 + $0x4c] sm:$0xf0]  ;;  %v211_v17 = vld [vmem:[%s1298_s6 + $0x44] sm:$0x1] }
  0x11   : > { %693 = vmatpush.bf16.msrb.mxu3 %v684_v8  ;;  %962 = vmatpush.bf16.msrb.mxu1 %v953_v11  ;;  %v203_v14 = vld [vmem:[%s1298_s6 + $0x40] sm:$0xf]  ;;  %v1107_v15 = vor.u32 %v1205_v13, %v1106_v12  ;;  %v204_v16 = vld [vmem:[%s1298_s6 + $0x50] sm:$0xf]  ;;  %v212_v18 = vld [vmem:[%s1298_s6 + $0x54] sm:$0x1] }
  0x12   : > { %627 = vmatpush.bf16.msrb.mxu2 %v618_v5  ;;  %896 = vmatpush.bf16.msrb.mxu0 %v887_v9  ;;  %v275_v19 = vshrl.u32 %v203_v14, 16  ;;  %v278_v20 = vshll.u32 %v203_v14, 16  ;;  %v284_v21 = vshll.u32 %v211_v17, 16  ;;  %v289_v22 = vshrl.u32 %v204_v16, 16  ;;  %v199_v23 = vld [vmem:[%s1298_s6] sm:$0xf]  ;;  %vm1315_vm4 = vmor %vm215_vm2, %vm216_vm3 }
  0x13   : > { %1114 = vmatmul.msk.bf16.vlgmr.msra.gmra.mxu3 %vm344_vm1, %v1107_v15  ;;  %v292_v24 = vshll.u32 %v204_v16, 16  ;;  %v298_v25 = vshll.u32 %v212_v18, 16  ;;  %v200_v26 = vld [vmem:[%s1298_s6 + $0x10] sm:$0xf]  ;;  %v207_v27 = vld [vmem:[%s1298_s6 + $0x4] sm:$0x1] }
  0x14   : > { %v277_v28 = vrot.slane %v275_v19, 4  ;;  %v280_v29 = vrot.slane %v278_v20, 5  ;;  %v286_v30 = vrot.slane %v284_v21, 5  ;;  %v291_v31 = vrot.slane %v289_v22, 4  ;;  %v208_v32 = vld [vmem:[%s1298_s6 + $0x14] sm:$0x1] }
  0x15   : > { %v294_v33 = vrot.slane %v292_v24, 5  ;;  %v300_v34 = vrot.slane %v298_v25, 5  ;;  %v219_v35 = vshrl.u32 %v199_v23, 16  ;;  %v222_v36 = vshll.u32 %v199_v23, 16  ;;  %v1098_v37 = vld [vmem:[%s1298_s6] sm:$0xf] }
  0x16   : > { %v281_v38 = vor.u32 %v280_v29, %v277_v28  ;;  %v228_v39 = vshll.u32 %v207_v27, 16  ;;  %v233_v40 = vshrl.u32 %v200_v26, 16  ;;  %v236_v41 = vshll.u32 %v200_v26, 16  ;;  %v1203_v42 = vld [vmem:[%s1298_s6 + $0xc] sm:$0xf0] }
  0x17   : > { %v295_v44 = vor.u32 %v294_v33, %v291_v31  ;;  %v221_v45 = vrot.slane %v219_v35, 4  ;;  %v224_v46 = vrot.slane %v222_v36, 5  ;;  %v242_v47 = vshll.u32 %v208_v32, 16  ;;  %v1110_v48 = vld [vmem:[%s1298_s6 + $0x60] sm:$0xf] }
  0x18   : > { %v282_v49 = vrot.slane %v281_v38, 4  ;;  %v230_v50 = vrot.slane %v228_v39, 5  ;;  %v235_v51 = vrot.slane %v233_v40, 4  ;;  %v238_v52 = vrot.slane %v236_v41, 5  ;;  %v1206_v53 = vld [vmem:[%s1298_s6 + $0x6c] sm:$0xf0] }
  0x19   : > { %v296_v54 = vrot.slane %v295_v44, 4  ;;  %v225_v55 = vor.u32 %v224_v46, %v221_v45  ;;  %v244_v56 = vrot.slane %v242_v47, 5  ;;  %v1099_v57 = vor.u32 %v1203_v42, %v1098_v37  ;;  %v205_v58 = vld [vmem:[%s1298_s6 + $0x60] sm:$0xf]  ;;  %v206_v62 = vld [vmem:[%s1298_s6 + $0x70] sm:$0xf] }
  0x1a   : > { %v287_v59 = vsel %vm1315_vm4, %v282_v49, %v286_v30  ;;  %v239_v60 = vor.u32 %v238_v52, %v235_v51  ;;  %v1111_v61 = vor.u32 %v1206_v53, %v1110_v48  ;;  %v213_v63 = vld [vmem:[%s1298_s6 + $0x64] sm:$0x1]  ;;  %v303_v0 = vshrl.u32 %v205_v58, 16  ;;  %v214_v4 = vld [vmem:[%s1298_s6 + $0x74] sm:$0x1] }
  0x1b   : > { %v301_v1 = vsel %vm1315_vm4, %v296_v54, %v300_v34  ;;  %v336_v2 = vunpack.c.l.b16 %v287_v59  ;;  %v226_v3 = vrot.slane %v225_v55, 4  ;;  %1112 = vmatmul.msk.bf16.vlgmr.msra.gmra.mxu1 %vm344_vm1, %v1099_v57  ;;  %v306_v5 = vshll.u32 %v205_v58, 16  ;;  %v201_v10 = vld [vmem:[%s1298_s6 + $0x20] sm:$0xf]  ;;  %v209_v15 = vld [vmem:[%s1298_s6 + $0x24] sm:$0x1] }
  0x1c   : > { %v337_v6 = vunpack.c.l.b16 %v301_v1  ;;  %v240_v7 = vrot.slane %v239_v60, 4  ;;  %v305_v8 = vrot.slane %v303_v0, 4  ;;  %v312_v9 = vshll.u32 %v213_v63, 16  ;;  %v202_v20 = vld [vmem:[%s1298_s6 + $0x30] sm:$0xf] }
  0x1d   : > { %v231_v11 = vsel %vm1315_vm4, %v226_v3, %v230_v50  ;;  %v308_v12 = vrot.slane %v306_v5, 5  ;;  %v317_v13 = vshrl.u32 %v206_v62, 16  ;;  %v320_v14 = vshll.u32 %v206_v62, 16  ;;  %v210_v26 = vld [vmem:[%s1298_s6 + $0x34] sm:$0x1] }
  0x1e   : > { %v342_v16 = vpack.c.b16 %v337_v6, %v336_v2  ;;  %v245_v17 = vsel %vm1315_vm4, %v240_v7, %v244_v56  ;;  %v332_v18 = vunpack.c.l.b16 %v231_v11  ;;  %v314_v19 = vrot.slane %v312_v9, 5  ;;  %v1102_v34 = vld [vmem:[%s1298_s6 + $0x20] sm:$0xf]  ;;  %v1204_v35 = vld [vmem:[%s1298_s6 + $0x2c] sm:$0xf0] }
  0x1f   : > { %v333_v21 = vunpack.c.l.b16 %v245_v17  ;;  %v309_v22 = vor.u32 %v308_v12, %v305_v8  ;;  %v319_v23 = vrot.slane %v317_v13, 4  ;;  %v322_v24 = vrot.slane %v320_v14, 5  ;;  %v1116_v40 = vld [vmem:[%s1298_s6 + $0x8] sm:$0xf]  ;;  %v1124_v46 = vld [vmem:[%s1298_s6 + $0xc] sm:$0x1] }
  0x20   : > { %1094 = vmatmul.msk.bf16.vlgmr.msra.gmra.mxu2 %vm344_vm1, %v342_v16  ;;  %v326_v25 = vshll.u32 %v214_v4, 16  ;;  %v247_v27 = vshrl.u32 %v201_v10, 16  ;;  %v250_v28 = vshll.u32 %v201_v10, 16  ;;  %v256_v29 = vshll.u32 %v209_v15, 16  ;;  %v1117_v51 = vld [vmem:[%s1298_s6 + $0x18] sm:$0xf] }
  0x21   : > { %v340_v30 = vpack.c.b16 %v333_v21, %v332_v18  ;;  %v310_v31 = vrot.slane %v309_v22, 4  ;;  %v323_v32 = vor.u32 %v322_v24, %v319_v23  ;;  %v261_v33 = vshrl.u32 %v202_v20, 16  ;;  %v1158_v3 = vld [vmem:[%s1298_s6 + $0x10] sm:$0xf]  ;;  %v1166_v8 = vld [vmem:[%s1298_s6 + $0x14] sm:$0x1] }
  0x22   : > { %v328_v36 = vrot.slane %v326_v25, 5  ;;  %v249_v37 = vrot.slane %v247_v27, 4  ;;  %v252_v38 = vrot.slane %v250_v28, 5  ;;  %v258_v39 = vrot.slane %v256_v29, 5  ;;  %v1159_v13 = vld [vmem:[%s1298_s6 + $0x20] sm:$0xf] }
  0x23   : > { %1092 = vmatmul.msk.bf16.vlgmr.msra.gmra.mxu0 %vm344_vm1, %v340_v30  ;;  %1115 = vmatmul.msk.bf16.gmra.mxu3 %vm344_vm1, %v1111_v61  ;;  %v315_v41 = vsel %vm1315_vm4, %v310_v31, %v314_v19  ;;  %v324_v42 = vrot.slane %v323_v32, 4  ;;  %v263_v44 = vrot.slane %v261_v33, 4  ;;  %v264_v45 = vshll.u32 %v202_v20, 16  ;;  %v1125_v61 = vld [vmem:[%s1298_s6 + $0x1c] sm:$0x1] }
  0x24   : > { %v338_v47 = vunpack.c.l.b16 %v315_v41  ;;  %v253_v48 = vor.u32 %v252_v38, %v249_v37  ;;  %v270_v49 = vshll.u32 %v210_v26, 16  ;;  %v1103_v50 = vor.u32 %v1204_v35, %v1102_v34  ;;  %v1167_v21 = vld [vmem:[%s1298_s6 + $0x24] sm:$0x1]  ;;  %v1118_v23 = vld [vmem:[%s1298_s6 + $0x28] sm:$0xf] }
  0x25   : > { %v329_v52 = vsel %vm1315_vm4, %v324_v42, %v328_v36  ;;  %v266_v53 = vrot.slane %v264_v45, 5  ;;  %v472_v54 = vshrl.u32 %v1116_v40, 16  ;;  %v475_v55 = vshll.u32 %v1116_v40, 16  ;;  %v1126_v28 = vld [vmem:[%s1298_s6 + $0x2c] sm:$0x1] }
  0x26   : > { %v339_v56 = vunpack.c.l.b16 %v329_v52  ;;  %v254_v57 = vrot.slane %v253_v48, 4  ;;  %v272_v58 = vrot.slane %v270_v49, 5  ;;  %v481_v59 = vshll.u32 %v1124_v46, 16  ;;  %v1119_v37 = vld [vmem:[%s1298_s6 + $0x38] sm:$0xf] }
  0x27   : > { %v267_v60 = vor.u32 %v266_v53, %v263_v44  ;;  %v474_v62 = vrot.slane %v472_v54, 4  ;;  %v477_v63 = vrot.slane %v475_v55, 5  ;;  %v486_v0 = vshrl.u32 %v1117_v51, 16  ;;  %v1127_v46 = vld [vmem:[%s1298_s6 + $0x3c] sm:$0x1] }
  0x28   : > { %v259_v1 = vsel %vm1315_vm4, %v254_v57, %v258_v39  ;;  %v489_v2 = vshll.u32 %v1117_v51, 16  ;;  %v483_v6 = vrot.slane %v481_v59, 5  ;;  %v343_v9 = vpack.c.b16 %v339_v56, %v338_v47  ;;  %v1160_v55 = vld [vmem:[%s1298_s6 + $0x30] sm:$0xf]  ;;  %v1161_v56 = vld [vmem:[%s1298_s6 + $0x40] sm:$0xf] }
  0x29   : > { %v268_v4 = vrot.slane %v267_v60, 4  ;;  %v478_v5 = vor.u32 %v477_v63, %v474_v62  ;;  %v488_v7 = vrot.slane %v486_v0, 4  ;;  %v334_v10 = vunpack.c.l.b16 %v259_v1  ;;  %v1135_v62 = vld [vmem:[%s1298_s6 + $0x8] sm:$0xf] }
  0x2a   : > { %v491_v11 = vrot.slane %v489_v2, 5  ;;  %v495_v12 = vshll.u32 %v1125_v61, 16  ;;  %v741_v16 = vshrl.u32 %v1158_v3, 16  ;;  %v744_v17 = vshll.u32 %v1158_v3, 16  ;;  %v1168_v61 = vld [vmem:[%s1298_s6 + $0x34] sm:$0x1] }
  0x2b   : > { %v273_v14 = vsel %vm1315_vm4, %v268_v4, %v272_v58  ;;  %1113 = vmatmul.msk.bf16.gmra.mxu1 %vm344_vm1, %v1103_v50  ;;  %v479_v15 = vrot.slane %v478_v5, 4  ;;  %v750_v22 = vshll.u32 %v1166_v8, 16  ;;  %v755_v27 = vshrl.u32 %v1159_v13, 16  ;;  %v1207_v2 = vld [vmem:[%s1298_s6 + $0x14] sm:$0xf0] }
  0x2c   : > { %v335_v18 = vunpack.c.l.b16 %v273_v14  ;;  %v492_v19 = vor.u32 %v491_v11, %v488_v7  ;;  %v497_v20 = vrot.slane %v495_v12, 5  ;;  %v743_v25 = vrot.slane %v741_v16, 4  ;;  %v1120_v16 = vld [vmem:[%s1298_s6 + $0x48] sm:$0xf] }
  0x2d   : > { %v484_v24 = vsel %vm1315_vm4, %v479_v15, %v483_v6  ;;  %v746_v26 = vrot.slane %v744_v17, 5  ;;  %v752_v32 = vrot.slane %v750_v22, 5  ;;  %v757_v34 = vrot.slane %v755_v27, 4  ;;  %v1147_v43 = vld [vmem:[%s1298_s6 + $0x68] sm:$0xf] }
  0x2e   : > { %v341_v29 = vpack.c.b16 %v335_v18, %v334_v10  ;;  %v493_v30 = vrot.slane %v492_v19, 4  ;;  %v659_v31 = vunpack.c.l.b16 %v484_v24  ;;  %v758_v35 = vshll.u32 %v1159_v13, 16 }
  0x2f   : > { %v747_v33 = vor.u32 %v746_v26, %v743_v25  ;;  %v764_v36 = vshll.u32 %v1167_v21, 16  ;;  %v500_v39 = vshrl.u32 %v1118_v23, 16  ;;  %v503_v40 = vshll.u32 %v1118_v23, 16  ;;  %v1121_v25 = vld [vmem:[%s1298_s6 + $0x58] sm:$0xf] }
  0x30   : > { %1095 = vmatmul.msk.bf16.gmra.mxu2 %vm344_vm1, %v343_v9  ;;  %v498_v38 = vsel %vm1315_vm4, %v493_v30, %v497_v20  ;;  %v509_v41 = vshll.u32 %v1126_v28, 16  ;;  %v760_v45 = vrot.slane %v758_v35, 5  ;;  %v514_v50 = vshrl.u32 %v1119_v37, 16  ;;  %v1169_v9 = vld [vmem:[%s1298_s6 + $0x44] sm:$0x1] }
  0x31   : > { %v660_v42 = vunpack.c.l.b16 %v498_v38  ;;  %v748_v44 = vrot.slane %v747_v33, 4  ;;  %v766_v47 = vrot.slane %v764_v36, 5  ;;  %v502_v48 = vrot.slane %v500_v39, 4  ;;  %v1128_v20 = vld [vmem:[%s1298_s6 + $0x4c] sm:$0x1] }
  0x32   : > { %v505_v49 = vrot.slane %v503_v40, 5  ;;  %v761_v53 = vor.u32 %v760_v45, %v757_v34  ;;  %v517_v54 = vshll.u32 %v1119_v37, 16  ;;  %v511_v58 = vrot.slane %v509_v41, 5  ;;  %v1177_v26 = vld [vmem:[%s1298_s6 + $0x10] sm:$0xf] }
  0x33   : > { %1093 = vmatmul.msk.bf16.gmra.mxu0 %vm344_vm1, %v341_v29  ;;  %v667_v51 = vpack.c.b16 %v660_v42, %v659_v31  ;;  %v753_v52 = vsel %vm1315_vm4, %v748_v44, %v752_v32  ;;  %v516_v59 = vrot.slane %v514_v50, 4  ;;  %v523_v60 = vshll.u32 %v1127_v46, 16  ;;  %v1211_v31 = vld [vmem:[%s1298_s6 + $0x1c] sm:$0xf0]  ;;  %v1392_v40 = vld [vmem:[%s1298_s6 + $0x28] sm:$0xf] }
  0x34   : > { %v506_v57 = vor.u32 %v505_v49, %v502_v48  ;;  %v762_v63 = vrot.slane %v761_v53, 4  ;;  %v928_v0 = vunpack.c.l.b16 %v753_v52  ;;  %v519_v1 = vrot.slane %v517_v54, 5  ;;  %v1129_v44 = vld [vmem:[%s1298_s6 + $0x5c] sm:$0x1]  ;;  %v1162_v46 = vld [vmem:[%s1298_s6 + $0x50] sm:$0xf] }
  0x35   : > { %1154 = vmatmul.msk.bf16.vlgmr.msrb.gmra.mxu3 %vm344_vm1, %v667_v51  ;;  %v525_v4 = vrot.slane %v523_v60, 5  ;;  %v769_v5 = vshrl.u32 %v1160_v55, 16  ;;  %v772_v6 = vshll.u32 %v1160_v55, 16  ;;  %v778_v10 = vshll.u32 %v1168_v61, 16  ;;  %v1397_v48 = vld [vmem:[%s1298_s6 + $0x34] sm:$0xf0] }
  0x36   : > { %v507_v3 = vrot.slane %v506_v57, 4  ;;  %v767_v7 = vsel %vm1315_vm4, %v762_v63, %v766_v47  ;;  %v520_v8 = vor.u32 %v519_v1, %v516_v59  ;;  %v783_v11 = vshrl.u32 %v1161_v56, 16  ;;  %v1163_v51 = vld [vmem:[%s1298_s6 + $0x60] sm:$0xf]  ;;  %v1170_v55 = vld [vmem:[%s1298_s6 + $0x54] sm:$0x1] }
  0x37   : > { %v929_v12 = vunpack.c.l.b16 %v767_v7  ;;  %v771_v14 = vrot.slane %v769_v5, 4  ;;  %v774_v15 = vrot.slane %v772_v6, 5  ;;  %v1136_v17 = vor.u32 %v1207_v2, %v1135_v62  ;;  %v1403_v57 = vld [vmem:[%s1298_s6 + $0x30] sm:$0xf]  ;;  %v1122_v6 = vld [vmem:[%s1298_s6 + $0x68] sm:$0xf] }
  0x38   : > { %v512_v13 = vsel %vm1315_vm4, %v507_v3, %v511_v58  ;;  %v521_v18 = vrot.slane %v520_v8, 4  ;;  %v785_v19 = vrot.slane %v783_v11, 4  ;;  %v786_v23 = vshll.u32 %v1161_v56, 16  ;;  %v1406_v58 = vld [vmem:[%s1298_s6 + $0x3c] sm:$0xf0] }
  0x39   : > { %v936_v21 = vpack.c.b16 %v929_v12, %v928_v0  ;;  %v775_v22 = vor.u32 %v774_v15, %v771_v14  ;;  %v792_v24 = vshll.u32 %v1169_v9, 16  ;;  %v661_v28 = vunpack.c.l.b16 %v512_v13  ;;  %v1130_v12 = vld [vmem:[%s1298_s6 + $0x6c] sm:$0x1] }
  0x3a   : > { %v526_v27 = vsel %vm1315_vm4, %v521_v18, %v525_v4  ;;  %v528_v29 = vshrl.u32 %v1120_v16, 16  ;;  %v531_v30 = vshll.u32 %v1120_v16, 16  ;;  %v780_v33 = vrot.slane %v778_v10, 5  ;;  %v1171_v10 = vld [vmem:[%s1298_s6 + $0x64] sm:$0x1] }
  0x3b   : > { %1196 = vmatmul.msk.bf16.vlgmr.msrb.gmra.mxu1 %vm344_vm1, %v936_v21  ;;  %v662_v32 = vunpack.c.l.b16 %v526_v27  ;;  %v788_v34 = vrot.slane %v786_v23, 5  ;;  %v537_v35 = vshll.u32 %v1128_v20, 16  ;;  %v776_v36 = vrot.slane %v775_v22, 4 }
  0x3c   : > { %v530_v37 = vrot.slane %v528_v29, 4  ;;  %v533_v38 = vrot.slane %v531_v30, 5  ;;  %v542_v39 = vshrl.u32 %v1121_v25, 16  ;;  %v794_v42 = vrot.slane %v792_v24, 5 }
  0x3d   : > { %v789_v41 = vor.u32 %v788_v34, %v785_v19  ;;  %v545_v45 = vshll.u32 %v1121_v25, 16  ;;  %v1178_v47 = vor.u32 %v1211_v31, %v1177_v26  ;;  %v539_v53 = vrot.slane %v537_v35, 5  ;;  %v1131_v25 = vld [vmem:[%s1298_s6 + $0x7c] sm:$0x1]  ;;  %v1164_v35 = vld [vmem:[%s1298_s6 + $0x70] sm:$0xf] }
  0x3e   : > { %v534_v49 = vor.u32 %v533_v38, %v530_v37  ;;  %v544_v50 = vrot.slane %v542_v39, 4  ;;  %v668_v56 = vpack.c.b16 %v662_v32, %v661_v28  ;;  %v781_v59 = vsel %vm1315_vm4, %v776_v36, %v780_v33 }
  0x3f   : > { %v790_v52 = vrot.slane %v789_v41, 4  ;;  %v547_v54 = vrot.slane %v545_v45, 5  ;;  %v551_v60 = vshll.u32 %v1129_v44, 16  ;;  %v797_v61 = vshrl.u32 %v1162_v46, 16  ;;  %v1165_v41 = vld [vmem:[%s1298_s6 + $0x80] sm:$0xf] }
  0x40   : > { %1149 = vmatmul.msk.bf16.vlgmr.msrb.gmra.mxu2 %vm344_vm1, %v1136_v17  ;;  %v535_v63 = vrot.slane %v534_v49, 4  ;;  %v800_v1 = vshll.u32 %v1162_v46, 16  ;;  %v1140_v2 = vor.u32 %v1397_v48, %v1392_v40  ;;  %v806_v4 = vshll.u32 %v1170_v55, 16  ;;  %v1123_v17 = vld [vmem:[%s1298_s6 + $0x78] sm:$0xf] }
  0x41   : > { %v795_v62 = vsel %vm1315_vm4, %v790_v52, %v794_v42  ;;  %v548_v0 = vor.u32 %v547_v54, %v544_v50  ;;  %v799_v3 = vrot.slane %v797_v61, 4  ;;  %v811_v5 = vshrl.u32 %v1163_v51, 16  ;;  %v1173_v55 = vld [vmem:[%s1298_s6 + $0x84] sm:$0x1] }
  0x42   : > { %v1182_v7 = vor.u32 %v1406_v58, %v1403_v57  ;;  %v930_v8 = vunpack.c.l.b16 %v781_v59  ;;  %v931_v9 = vunpack.c.l.b16 %v795_v62  ;;  %v802_v11 = vrot.slane %v800_v1, 5  ;;  %v1143_v58 = vld [vmem:[%s1298_s6 + $0x48] sm:$0xf] }
  0x43   : > { %1191 = vmatmul.msk.bf16.vlgmr.msrb.gmra.mxu0 %vm344_vm1, %v1178_v47  ;;  %v549_v13 = vrot.slane %v548_v0, 4  ;;  %v553_v14 = vrot.slane %v551_v60, 5  ;;  %v813_v15 = vrot.slane %v811_v5, 4  ;;  %v814_v16 = vshll.u32 %v1163_v51, 16  ;;  %v1172_v47 = vld [vmem:[%s1298_s6 + $0x74] sm:$0x1] }
  0x44   : > { %v540_v18 = vsel %vm1315_vm4, %v535_v63, %v539_v53  ;;  %v803_v19 = vor.u32 %v802_v11, %v799_v3  ;;  %v556_v20 = vshrl.u32 %v1122_v6, 16  ;;  %v559_v21 = vshll.u32 %v1122_v6, 16 }
  0x45   : > { %1155 = vmatmul.msk.bf16.gmra.mxu3 %vm344_vm1, %v668_v56  ;;  %v808_v22 = vrot.slane %v806_v4, 5  ;;  %v816_v23 = vrot.slane %v814_v16, 5  ;;  %v820_v24 = vshll.u32 %v1171_v10, 16  ;;  %v565_v26 = vshll.u32 %v1130_v12, 16 }
  0x46   : > { %v937_v27 = vpack.c.b16 %v931_v9, %v930_v8  ;;  %v558_v28 = vrot.slane %v556_v20, 4  ;;  %v561_v29 = vrot.slane %v559_v21, 5  ;;  %v570_v30 = vshrl.u32 %v1123_v17, 16 }
  0x47   : > { %v554_v31 = vsel %vm1315_vm4, %v549_v13, %v553_v14  ;;  %v804_v32 = vrot.slane %v803_v19, 4  ;;  %v817_v33 = vor.u32 %v816_v23, %v813_v15  ;;  %v573_v34 = vshll.u32 %v1123_v17, 16 }
  0x48   : > { %v562_v36 = vor.u32 %v561_v29, %v558_v28  ;;  %v567_v37 = vrot.slane %v565_v26, 5  ;;  %v572_v38 = vrot.slane %v570_v30, 4  ;;  %v579_v39 = vshll.u32 %v1131_v25, 16  ;;  %v1213_v25 = vld [vmem:[%s1298_s6 + $0x5c] sm:$0xf0] }
  0x49   : > { %v663_v42 = vunpack.c.l.b16 %v540_v18  ;;  %v818_v44 = vrot.slane %v817_v33, 4  ;;  %v822_v45 = vrot.slane %v820_v24, 5  ;;  %v575_v46 = vrot.slane %v573_v34, 5  ;;  %v1185_v24 = vld [vmem:[%s1298_s6 + $0x50] sm:$0xf] }
  0x4a   : > { %v664_v49 = vunpack.c.l.b16 %v554_v31  ;;  %v563_v50 = vrot.slane %v562_v36, 4  ;;  %v825_v51 = vshrl.u32 %v1164_v35, 16  ;;  %v828_v52 = vshll.u32 %v1164_v35, 16  ;;  %v1189_v29 = vld [vmem:[%s1298_s6 + $0x70] sm:$0xf] }
  0x4b   : > { %1197 = vmatmul.msk.bf16.gmra.mxu1 %vm344_vm1, %v937_v27  ;;  %v576_v53 = vor.u32 %v575_v46, %v572_v38  ;;  %v581_v54 = vrot.slane %v579_v39, 5  ;;  %v834_v56 = vshll.u32 %v1172_v47, 16  ;;  %v839_v59 = vshrl.u32 %v1165_v41, 16  ;;  %v1210_v27 = vld [vmem:[%s1298_s6 + $0x74] sm:$0xf0] }
  0x4c   : > { %v809_v60 = vsel %vm1315_vm4, %v804_v32, %v808_v22  ;;  %v568_v61 = vsel %vm1315_vm4, %v563_v50, %v567_v37  ;;  %v827_v62 = vrot.slane %v825_v51, 4  ;;  %v830_v63 = vrot.slane %v828_v52, 5  ;;  %v1214_v30 = vld [vmem:[%s1298_s6 + $0x7c] sm:$0xf0] }
  0x4d   : > { %v823_v0 = vsel %vm1315_vm4, %v818_v44, %v822_v45  ;;  %v577_v1 = vrot.slane %v576_v53, 4  ;;  %v665_v3 = vunpack.c.l.b16 %v568_v61  ;;  %v836_v4 = vrot.slane %v834_v56, 5 }
  0x4e   : > { %v831_v5 = vor.u32 %v830_v63, %v827_v62  ;;  %v841_v6 = vrot.slane %v839_v59, 4  ;;  %v842_v8 = vshll.u32 %v1165_v41, 16  ;;  %v848_v9 = vshll.u32 %v1173_v55, 16  ;;  %v1487_v63 = vld [vmem:[%s1533_s3] ss:$0 sm:$0xff] }
  0x4f   : > { %v669_v10 = vpack.c.b16 %v664_v49, %v663_v42  ;;  %v582_v11 = vsel %vm1315_vm4, %v577_v1, %v581_v54  ;;  %v932_v40 = vunpack.c.l.b16 %v809_v60  ;;  %v933_v48 = vunpack.c.l.b16 %v823_v0 }
  0x50   : > { %1150 = vmatmul.msk.bf16.gmra.mxu2 %vm344_vm1, %v1140_v2  ;;  %v666_v12 = vunpack.c.l.b16 %v582_v11  ;;  %v832_v13 = vrot.slane %v831_v5, 4  ;;  %v844_v14 = vrot.slane %v842_v8, 5  ;;  %v850_v17 = vrot.slane %v848_v9, 5 }
  0x51   : > { %v938_v20 = vpack.c.b16 %v933_v48, %v932_v40  ;;  %v1186_v26 = vor.u32 %v1213_v25, %v1185_v24  ;;  %v1148_v28 = vor.u32 %v1210_v27, %v1147_v43  ;;  %v1190_v31 = vor.u32 %v1214_v30, %v1189_v29 }
  0x52   : > { %v670_v2 = vpack.c.b16 %v666_v12, %v665_v3  ;;  %v837_v15 = vsel %vm1315_vm4, %v832_v13, %v836_v4  ;;  %v845_v16 = vor.u32 %v844_v14, %v841_v6 }
  0x53   : > { %1192 = vmatmul.msk.bf16.gmra.mxu0 %vm344_vm1, %v1182_v7  ;;  %v934_v19 = vunpack.c.l.b16 %v837_v15  ;;  %v1209_v7 = vld [vmem:[%s1298_s6 + $0x54] sm:$0xf0] }
  0x54   : > { %v846_v18 = vrot.slane %v845_v16, 4  ;;  %v1144_v23 = vor.u32 %v1209_v7, %v1143_v58 }
  0x55   : > { %1156 = vmatmul.msk.bf16.gmra.mxu3 %vm344_vm1, %v669_v10 }
  0x56   : > { %v851_v57 = vsel %vm1315_vm4, %v846_v18, %v850_v17 }
  0x57   : > { %v935_v21 = vunpack.c.l.b16 %v851_v57 }
  0x59   : > { %v939_v22 = vpack.c.b16 %v935_v21, %v934_v19 }
  0x5b   : > { %1198 = vmatmul.msk.bf16.gmra.mxu1 %vm344_vm1, %v938_v20 }
  0x60   : > { %1151 = vmatmul.msk.bf16.gmra.mxu2 %vm344_vm1, %v1144_v23 }
  0x63   : > { %1193 = vmatmul.msk.bf16.gmra.mxu0 %vm344_vm1, %v1186_v26 }
  0x65   : > { %1157 = vmatmul.msk.bf16.gmra.mxu3 %vm344_vm1, %v670_v2 }
  0x6b   : > { %1199 = vmatmul.msk.bf16.gmra.mxu1 %vm344_vm1, %v939_v22 }
  0x70   : > { %1152 = vmatmul.msk.bf16.gmra.mxu2 %vm344_vm1, %v1148_v28 }
  0x73   : > { %1194 = vmatmul.msk.bf16.gmra.mxu0 %vm344_vm1, %v1190_v31 }
  0x96   : > { %v1468_v32 = vpop.f32.mrf.mxu3 }
  0x98   : > { %v434_v33 = vpop.f32.mrf.mxu1 }
  0x9e   : > { %v1470_v34 = vpop.f32.mrf.mxu3 }
  0xa0   : > { %v370_v35 = vpop.f32.mrf.mxu0  ;;  %v436_v36 = vpop.f32.mrf.mxu1 }
  0xa1   : > { %v435_v55 = vadd.f32 %v434_v33, %v370_v35 }
  0xa3   : > { %v1472_v37 = vpop.f32.mrf.mxu2 }
  0xa4   : > { %v445_v31 = vadd.f32 %v1468_v32, %v1472_v37 }
  0xa6   : > { %v1474_v38 = vpop.f32.mrf.mxu3 }
  0xa8   : > { %v372_v39 = vpop.f32.mrf.mxu0  ;;  %v439_v41 = vpop.f32.mrf.mxu1 }
  0xa9   : > { %v437_v1 = vadd.f32 %v436_v36, %v372_v39 }
  0xab   : > { %v1476_v42 = vpop.f32.mrf.mxu2 }
  0xae   : > { %v1478_v44 = vpop.f32.mrf.mxu3 }
  0xb0   : > { %v375_v45 = vpop.f32.mrf.mxu0  ;;  %v441_v47 = vpop.f32.mrf.mxu1 }
  0xb1   : > { %v440_v40 = vadd.f32 %v439_v41, %v375_v45 }
  0xb3   : > { %v1480_v46 = vpop.f32.mrf.mxu2 }
  0xb8   : > { %v377_v49 = vpop.f32.mrf.mxu0  ;;  %v695_v50 = vpop.f32.mrf.mxu3 }
  0xb9   : > { %v964_v52 = vpop.f32.mrf.mxu1  ;;  %v442_v21 = vadd.f32 %v441_v47, %v377_v49 }
  0xbb   : > { %v1482_v51 = vpop.f32.mrf.mxu2 }
  0xc0   : > { %v898_v53 = vpop.f32.mrf.mxu0  ;;  %v697_v54 = vpop.f32.mrf.mxu3 }
  0xc1   : > { %v966_v60 = vpop.f32.mrf.mxu1 }
  0xc3   : > { %v629_v56 = vpop.f32.mrf.mxu2 }
  0xc4   : > { %v649_v59 = vadd.f32 %v629_v56, %v435_v55 }
  0xc6   : > { %v715_v61 = vadd.f32 %v695_v50, %v649_v59 }
  0xc8   : > { %v918_v62 = vadd.f32 %v898_v53, %v715_v61  ;;  %v900_v0 = vpop.f32.mrf.mxu0  ;;  %v700_v5 = vpop.f32.mrf.mxu3  ;;  %v447_v53 = vadd.f32 %v1470_v34, %v1476_v42 }
  0xc9   : > { %v969_v11 = vpop.f32.mrf.mxu1 }
  0xca   : > { %v984_v3 = vadd.f32 %v964_v52, %v918_v62 }
  0xcb   : > { %v631_v4 = vpop.f32.mrf.mxu2 }
  0xcc   : > { %v996_v6 = vadd.f32 %v1487_v63, %v984_v3  ;;  %v650_v8 = vadd.f32 %v631_v4, %v437_v1  ;;  %v450_v1 = vadd.f32 %v1474_v38, %v1480_v46 }
  0xce   : > { %v1004_v9 = vmax.f32 %v996_v6, 0.0  ;;  %v716_v10 = vadd.f32 %v697_v54, %v650_v8 }
  0xd0   : > { %v1012_v12 = vpack.c.bf16 %v1004_v9, %v1004_v9  ;;  %v919_v13 = vadd.f32 %v900_v0, %v716_v10  ;;  %v903_v14 = vpop.f32.mrf.mxu0  ;;  %v702_v17 = vpop.f32.mrf.mxu3 }
  0xd1   : > { %v971_v7 = vpop.f32.mrf.mxu1 }
  0xd2   : > { %1021 = vst.msk [vmem:[%s1494_s12] sm:$0xf] %vm1020_vm5, %v1012_v12  ;;  %v985_v48 = vadd.f32 %v966_v60, %v919_v13  ;;  %v452_v13 = vadd.f32 %v1478_v44, %v1482_v51 }
  0xd3   : > { %v634_v2 = vpop.f32.mrf.mxu2 }
  0xd4   : > { %v997_v15 = vadd.f32 %v1487_v63, %v985_v48  ;;  %v651_v16 = vadd.f32 %v634_v2, %v440_v40 }
  0xd6   : > { %v1005_v18 = vmax.f32 %v997_v15, 0.0  ;;  %v717_v19 = vadd.f32 %v700_v5, %v651_v16 }
  0xd8   : > { %v1013_v20 = vpack.c.bf16 %v1005_v18, %v1005_v18  ;;  %v920_v57 = vadd.f32 %v903_v14, %v717_v19  ;;  %v905_v58 = vpop.f32.mrf.mxu0  ;;  %v705_v27 = vpop.f32.mrf.mxu3 }
  0xd9   : > { %v974_v35 = vpop.f32.mrf.mxu1 }
  0xda   : > { %1022 = vst.msk [vmem:[%s1494_s12 + $0x4] sm:$0xf] %vm1020_vm5, %v1013_v20  ;;  %v986_v22 = vadd.f32 %v969_v11, %v920_v57 }
  0xdb   : > { %v636_v23 = vpop.f32.mrf.mxu2 }
  0xdc   : > { %v998_v24 = vadd.f32 %v1487_v63, %v986_v22  ;;  %v652_v25 = vadd.f32 %v636_v23, %v442_v21 }
  0xde   : > { %v1006_v26 = vmax.f32 %v998_v24, 0.0  ;;  %v718_v43 = vadd.f32 %v702_v17, %v652_v25 }
  0xe0   : > { %v1014_v28 = vpack.c.bf16 %v1006_v26, %v1006_v26  ;;  %v921_v29 = vadd.f32 %v905_v58, %v718_v43  ;;  %v908_v30 = vpop.f32.mrf.mxu0  ;;  %v707_v52 = vpop.f32.mrf.mxu3 }
  0xe1   : > { %v976_v59 = vpop.f32.mrf.mxu1 }
  0xe2   : > { %1023 = vst.msk [vmem:[%s1494_s12 + $0x8] sm:$0xf] %vm1020_vm5, %v1014_v28  ;;  %v987_v33 = vadd.f32 %v971_v7, %v921_v29 }
  0xe3   : > { %v639_v36 = vpop.f32.mrf.mxu2 }
  0xe4   : > { %v999_v39 = vadd.f32 %v1487_v63, %v987_v33  ;;  %v653_v41 = vadd.f32 %v639_v36, %v445_v31 }
  0xe6   : > { %v1007_v45 = vmax.f32 %v999_v39, 0.0  ;;  %v719_v47 = vadd.f32 %v705_v27, %v653_v41 }
  0xe8   : > { %v1015_v49 = vpack.c.bf16 %v1007_v45, %v1007_v45  ;;  %v922_v50 = vadd.f32 %v908_v30, %v719_v47  ;;  %v910_v37 = vpop.f32.mrf.mxu0  ;;  %v710_v42 = vpop.f32.mrf.mxu3 }
  0xe9   : > { %v979_v10 = vpop.f32.mrf.mxu1 }
  0xea   : > { %1024 = vst.msk [vmem:[%s1494_s12 + $0xc] sm:$0xf] %vm1020_vm5, %v1015_v49  ;;  %v988_v32 = vadd.f32 %v974_v35, %v922_v50 }
  0xeb   : > { %v641_v54 = vpop.f32.mrf.mxu2 }
  0xec   : > { %v1000_v55 = vadd.f32 %v1487_v63, %v988_v32  ;;  %v654_v56 = vadd.f32 %v641_v54, %v447_v53 }
  0xee   : > { %v1008_v60 = vmax.f32 %v1000_v55, 0.0  ;;  %v720_v61 = vadd.f32 %v707_v52, %v654_v56 }
  0xf0   : > { %v1016_v62 = vpack.c.bf16 %v1008_v60, %v1008_v60  ;;  %v923_v0 = vadd.f32 %v910_v37, %v720_v61  ;;  %v913_v6 = vpop.f32.mrf.mxu0  ;;  %v712_v48 = vpop.f32.mrf.mxu3 }
  0xf1   : > { %v981_v19 = vpop.f32.mrf.mxu1 }
  0xf2   : > { %1025 = vst.msk [vmem:[%s1494_s12 + $0x10] sm:$0xf] %vm1020_vm5, %v1016_v62  ;;  %v989_v34 = vadd.f32 %v976_v59, %v923_v0 }
  0xf3   : > { %v644_v3 = vpop.f32.mrf.mxu2 }
  0xf4   : > { %v1001_v4 = vadd.f32 %v1487_v63, %v989_v34  ;;  %v655_v5 = vadd.f32 %v644_v3, %v450_v1 }
  0xf6   : > { %v1009_v8 = vmax.f32 %v1001_v4, 0.0  ;;  %v721_v9 = vadd.f32 %v710_v42, %v655_v5 }
  0xf8   : > { %v1017_v11 = vpack.c.bf16 %v1009_v8, %v1009_v8  ;;  %v924_v12 = vadd.f32 %v913_v6, %v721_v9  ;;  %v915_v16 = vpop.f32.mrf.mxu0 }
  0xfa   : > { %1026 = vst.msk [vmem:[%s1494_s12 + $0x14] sm:$0xf] %vm1020_vm5, %v1017_v11  ;;  %v990_v38 = vadd.f32 %v979_v10, %v924_v12 }
  0xfb   : > { %v646_v46 = vpop.f32.mrf.mxu2 }
  0xfc   : > { %v1002_v14 = vadd.f32 %v1487_v63, %v990_v38  ;;  %v656_v40 = vadd.f32 %v646_v46, %v452_v13 }
  0xfe   : > { %v1010_v2 = vmax.f32 %v1002_v14, 0.0  ;;  %v722_v15 = vadd.f32 %v712_v48, %v656_v40 }
 0x100   : > { %v1018_v17 = vpack.c.bf16 %v1010_v2, %v1010_v2  ;;  %v925_v18 = vadd.f32 %v915_v16, %v722_v15 }
 0x102   : > { %1027 = vst.msk [vmem:[%s1494_s12 + $0x18] sm:$0xf] %vm1020_vm5, %v1018_v17  ;;  %v991_v20 = vadd.f32 %v981_v19, %v925_v18 }
 0x104   : > { %v1003_v44 = vadd.f32 %v1487_v63, %v991_v20 }
 0x106   : > { %v1011_v51 = vmax.f32 %v1003_v44, 0.0 }
 0x108   : > { %v1019_v57 = vpack.c.bf16 %v1011_v51, %v1011_v51 }
 0x10a   : > { %1028 = vst.msk [vmem:[%s1494_s12 + $0x1c] sm:$0xf] %vm1020_vm5, %v1019_v57 }
 0x10b PF: > { %s14_s15 = sadd.s32 1, %s1233_s15  }
 0x10c   : > { %p11_p4 = scmp.ge.s32.totalorder %s14_s15, 4  }
 0x10e   :  { %13 = sbr.rel (!%p11_p4) target bundleno = 1 (0x1), region = 72 }

// kernel: _lambda_.9
= control target key start
LH: loop header
LB: loop body
LE: loop exit
PB: predicated region body
PF: predicated region fallthrough
CT: control target
= control target key end

     0   :  { %s769_s15 = smov 0   ;;  %s971_s0 = inlined_call_operand.vmem [shape: bf16[512,4], index: 0, kind: input, shape index: {}]   ;;  %s972_s1 = inlined_call_operand.vmem [shape: f32[512,4], index: 1, kind: input, shape index: {}]   ;;  %s973_s2 = inlined_call_operand.vmem [shape: bf16[4,7], index: 2, kind: input, shape index: {}]   ;;  %s974_s3 = inlined_call_operand.vmem [shape: f32[1,7], index: 3, kind: input, shape index: {}]   ;;  %s975_s4 = inlined_call_operand.vmem [shape: f32[512,7], index: 4, kind: output, shape index: {}]  }
   0x1 LB: > { %s616_s16 = sadd.s32 4294967295, %s742_s15   ;;  %p620_p0 = scmp.ge.s32.totalorder %s742_s15, 1  ;;  %s742_s15 = sphi %s769_s15, %s14_s15  }
   0x2   : > { %p174_p1 = scmp.lt.s32.totalorder %s742_s15, 3 }
   0x4   : > { %p175_p2 = pnand %p620_p0, %p174_p1 }
   0x5   : > { %s621_s19 = sshll.u32 (!%p175_p2), %s616_s16, 5 }
   0x6   : > { %178 = sbr.rel (%p175_p2) target bundleno = 218 (0xda), region = 36  ;;  %p206_p3 = scmp.lt.s32.totalorder (!%p175_p2), %s621_s19, 63 }
   0xb   : > { %v368_v0 = vld [vmem:[%s973_s2] sm:$0x3]  ;;  %vm422_vm0 = vcmask 1041408   ;;  %s977_s19 = smov (!%p206_p3, %s621_s19), 63  ;;  %vm373_vm1 = vcmask 31744   ;;  %vm515_vm2 = vcmask 56320  }
   0xc   : > { %v424_v1 = vsel %vm422_vm0, %v368_v0, 0  ;;  %s622_s20 = sshll.u32 %s977_s19, 2  ;;  %s624_s21 = sshll.u32 %s977_s19, 3 }
   0xd   : > { %433 = vmatpush.bf16.msra.mxu0 %v424_v1  ;;  %724 = vmatpush.bf16.msra.mxu1 %v424_v1  ;;  %s787_s24 = scalar_lea.vmem %s971_s0, %s622_s20  ;;  %s794_s27 = scalar_lea.vmem %s972_s1, %s624_s21 }
   0xe   : > { %725 = vmatpush.bf16.msra.mxu2 %v424_v1  ;;  %726 = vmatpush.bf16.msra.mxu3 %v424_v1  ;;  %v646_v2 = vld [vmem:[%s787_s24] sm:$0xff]   ;;  %v289_v4 = vld [vmem:[%s794_s27 + $0x8] sm:$0xff]  ;;  %v290_v40 = vld [vmem:[%s794_s27 + $0x10] sm:$0xff]  ;;  %s870_s6 = scalar_lea.vmem %s975_s4, %s624_s21 }
   0xf   : > { %v288_v3 = vld [vmem:[%s794_s27] sm:$0xff]  ;;  %v647_v5 = vunpack.c.l.bf16 %v646_v2  ;;  %v648_v6 = vunpack.c.h.bf16 %v646_v2  ;;  %v297_v9 = vld [vmem:[%s794_s27 + $0x48] sm:$0xff]  ;;  %v291_v41 = vld [vmem:[%s794_s27 + $0x18] sm:$0xff] }
  0x10   : > { %v712_v7 = vld [vmem:[%s787_s24 + $0x20] sm:$0xff]   ;;  %v305_v14 = vld [vmem:[%s794_s27 + $0x88] sm:$0xff]  ;;  %v298_v44 = vld [vmem:[%s794_s27 + $0x50] sm:$0xff] }
  0x11   : > { %v296_v8 = vld [vmem:[%s794_s27 + $0x40] sm:$0xff]  ;;  %v663_v10 = vunpack.c.l.bf16 %v712_v7  ;;  %v664_v11 = vunpack.c.h.bf16 %v712_v7  ;;  %v320_v15 = vadd.f32 %v647_v5, %v288_v3  ;;  %v321_v16 = vadd.f32 %v648_v6, %v289_v4  ;;  %v313_v21 = vld [vmem:[%s794_s27 + $0xc8] sm:$0xff]  ;;  %v299_v45 = vld [vmem:[%s794_s27 + $0x58] sm:$0xff] }
  0x12   : > { %v716_v12 = vld [vmem:[%s787_s24 + $0x40] sm:$0xff]   ;;  %v709_v34 = vld [vmem:[%s787_s24 + $0x8] sm:$0xff]   ;;  %v306_v48 = vld [vmem:[%s794_s27 + $0x90] sm:$0xff] }
  0x13   : > { %v304_v13 = vld [vmem:[%s794_s27 + $0x80] sm:$0xff]  ;;  %v679_v17 = vunpack.c.l.bf16 %v716_v12  ;;  %v680_v18 = vunpack.c.h.bf16 %v716_v12  ;;  %v328_v22 = vadd.f32 %v663_v10, %v296_v8  ;;  %v329_v23 = vadd.f32 %v664_v11, %v297_v9  ;;  %v713_v35 = vld [vmem:[%s787_s24 + $0x28] sm:$0xff]   ;;  %v307_v49 = vld [vmem:[%s794_s27 + $0x98] sm:$0xff] }
  0x14   : > { %v720_v19 = vld [vmem:[%s787_s24 + $0x60] sm:$0xff]   ;;  %v352_v26 = vpack.c.bf16 %v321_v16, %v320_v15  ;;  %v717_v36 = vld [vmem:[%s787_s24 + $0x48] sm:$0xff]   ;;  %v651_v37 = vunpack.c.l.bf16 %v709_v34  ;;  %v652_v38 = vunpack.c.h.bf16 %v709_v34  ;;  %v667_v42 = vunpack.c.l.bf16 %v713_v35  ;;  %v314_v54 = vld [vmem:[%s794_s27 + $0xd0] sm:$0xff] }
  0x15   : > { %v312_v20 = vld [vmem:[%s794_s27 + $0xc0] sm:$0xff]  ;;  %v695_v24 = vunpack.c.l.bf16 %v720_v19  ;;  %v696_v25 = vunpack.c.h.bf16 %v720_v19  ;;  %v336_v27 = vadd.f32 %v679_v17, %v304_v13  ;;  %v337_v28 = vadd.f32 %v680_v18, %v305_v14  ;;  %v721_v39 = vld [vmem:[%s787_s24 + $0x68] sm:$0xff]   ;;  %v315_v55 = vld [vmem:[%s794_s27 + $0xd8] sm:$0xff] }
  0x16   : > { %v356_v29 = vpack.c.bf16 %v329_v23, %v328_v22  ;;  %627 = vmatmul.msk.bf16.vlgmr.msra.gmra.mxu0 %vm373_vm1, %v352_v26  ;;  %v668_v43 = vunpack.c.h.bf16 %v713_v35  ;;  %v683_v46 = vunpack.c.l.bf16 %v717_v36  ;;  %v684_v47 = vunpack.c.h.bf16 %v717_v36  ;;  %v710_v2 = vld [vmem:[%s787_s24 + $0x10] sm:$0xff]   ;;  %v292_v8 = vld [vmem:[%s794_s27 + $0x20] sm:$0xff]  ;;  %v293_v9 = vld [vmem:[%s794_s27 + $0x28] sm:$0xff] }
  0x17   : > { %v344_v30 = vadd.f32 %v695_v24, %v312_v20  ;;  %v345_v31 = vadd.f32 %v696_v25, %v313_v21  ;;  %v360_v32 = vpack.c.bf16 %v337_v28, %v336_v27  ;;  %v699_v50 = vunpack.c.l.bf16 %v721_v39  ;;  %v714_v3 = vld [vmem:[%s787_s24 + $0x30] sm:$0xff]   ;;  %v300_v12 = vld [vmem:[%s794_s27 + $0x60] sm:$0xff]  ;;  %v301_v13 = vld [vmem:[%s794_s27 + $0x68] sm:$0xff] }
  0x18   : > { %631 = vmatmul.msk.bf16.vlgmr.msra.gmra.mxu1 %vm373_vm1, %v356_v29  ;;  %v700_v51 = vunpack.c.h.bf16 %v721_v39  ;;  %v322_v52 = vadd.f32 %v651_v37, %v290_v40  ;;  %v323_v53 = vadd.f32 %v652_v38, %v291_v41  ;;  %v330_v56 = vadd.f32 %v667_v42, %v298_v44  ;;  %v718_v4 = vld [vmem:[%s787_s24 + $0x50] sm:$0xff]   ;;  %v308_v16 = vld [vmem:[%s794_s27 + $0xa0] sm:$0xff]  ;;  %v309_v17 = vld [vmem:[%s794_s27 + $0xa8] sm:$0xff] }
  0x19   : > { %v364_v33 = vpack.c.bf16 %v345_v31, %v344_v30  ;;  %635 = vmatmul.msk.bf16.vlgmr.msra.gmra.mxu2 %vm373_vm1, %v360_v32  ;;  %v331_v57 = vadd.f32 %v668_v43, %v299_v45  ;;  %v338_v58 = vadd.f32 %v683_v46, %v306_v48  ;;  %v339_v59 = vadd.f32 %v684_v47, %v307_v49  ;;  %v722_v7 = vld [vmem:[%s787_s24 + $0x70] sm:$0xff]   ;;  %v316_v22 = vld [vmem:[%s794_s27 + $0xe0] sm:$0xff]  ;;  %v317_v23 = vld [vmem:[%s794_s27 + $0xe8] sm:$0xff] }
  0x1a   : > { %v346_v60 = vadd.f32 %v699_v50, %v314_v54  ;;  %v347_v61 = vadd.f32 %v700_v51, %v315_v55  ;;  %v353_v62 = vpack.c.bf16 %v323_v53, %v322_v52  ;;  %v655_v5 = vunpack.c.l.bf16 %v710_v2  ;;  %v711_v34 = vld [vmem:[%s787_s24 + $0x18] sm:$0xff]   ;;  %v294_v40 = vld [vmem:[%s794_s27 + $0x30] sm:$0xff] }
  0x1b   : > { %639 = vmatmul.msk.bf16.vlgmr.msra.gmra.mxu3 %vm373_vm1, %v364_v33  ;;  %v357_v63 = vpack.c.bf16 %v331_v57, %v330_v56  ;;  %v361_v0 = vpack.c.bf16 %v339_v59, %v338_v58  ;;  %v656_v6 = vunpack.c.h.bf16 %v710_v2  ;;  %v671_v10 = vunpack.c.l.bf16 %v714_v3  ;;  %v715_v35 = vld [vmem:[%s787_s24 + $0x38] sm:$0xff]   ;;  %v302_v44 = vld [vmem:[%s794_s27 + $0x70] sm:$0xff]  ;;  %v863_v2 = vld [vmem:[%s974_s3] ss:$0 sm:$0xff] }
  0x1c   : > { %v365_v1 = vpack.c.bf16 %v347_v61, %v346_v60  ;;  %v672_v11 = vunpack.c.h.bf16 %v714_v3  ;;  %v687_v14 = vunpack.c.l.bf16 %v718_v4  ;;  %v688_v15 = vunpack.c.h.bf16 %v718_v4  ;;  %v719_v36 = vld [vmem:[%s787_s24 + $0x58] sm:$0xff]   ;;  %v310_v48 = vld [vmem:[%s794_s27 + $0xb0] sm:$0xff] }
  0x1d   : > { %v703_v18 = vunpack.c.l.bf16 %v722_v7  ;;  %v704_v19 = vunpack.c.h.bf16 %v722_v7  ;;  %v324_v20 = vadd.f32 %v655_v5, %v292_v8  ;;  %v325_v21 = vadd.f32 %v656_v6, %v293_v9  ;;  %v723_v39 = vld [vmem:[%s787_s24 + $0x78] sm:$0xff]   ;;  %v318_v54 = vld [vmem:[%s794_s27 + $0xf0] sm:$0xff] }
  0x1e   : > { %v332_v24 = vadd.f32 %v671_v10, %v300_v12  ;;  %v333_v25 = vadd.f32 %v672_v11, %v301_v13  ;;  %v340_v26 = vadd.f32 %v687_v14, %v308_v16  ;;  %v341_v27 = vadd.f32 %v688_v15, %v309_v17  ;;  %v295_v41 = vld [vmem:[%s794_s27 + $0x38] sm:$0xff] }
  0x1f   : > { %v348_v28 = vadd.f32 %v703_v18, %v316_v22  ;;  %v349_v29 = vadd.f32 %v704_v19, %v317_v23  ;;  %v354_v30 = vpack.c.bf16 %v325_v21, %v324_v20  ;;  %v659_v37 = vunpack.c.l.bf16 %v711_v34  ;;  %v303_v45 = vld [vmem:[%s794_s27 + $0x78] sm:$0xff] }
  0x20   : > { %v358_v31 = vpack.c.bf16 %v333_v25, %v332_v24  ;;  %v362_v32 = vpack.c.bf16 %v341_v27, %v340_v26  ;;  %v660_v38 = vunpack.c.h.bf16 %v711_v34  ;;  %v675_v42 = vunpack.c.l.bf16 %v715_v35  ;;  %v311_v49 = vld [vmem:[%s794_s27 + $0xb8] sm:$0xff] }
  0x21   : > { %v366_v33 = vpack.c.bf16 %v349_v29, %v348_v28  ;;  %v676_v43 = vunpack.c.h.bf16 %v715_v35  ;;  %v691_v46 = vunpack.c.l.bf16 %v719_v36  ;;  %v692_v47 = vunpack.c.h.bf16 %v719_v36  ;;  %v319_v55 = vld [vmem:[%s794_s27 + $0xf8] sm:$0xff] }
  0x22   : > { %v707_v50 = vunpack.c.l.bf16 %v723_v39  ;;  %v708_v51 = vunpack.c.h.bf16 %v723_v39  ;;  %v326_v52 = vadd.f32 %v659_v37, %v294_v40  ;;  %v327_v53 = vadd.f32 %v660_v38, %v295_v41 }
  0x23   : > { %v334_v56 = vadd.f32 %v675_v42, %v302_v44  ;;  %v335_v57 = vadd.f32 %v676_v43, %v303_v45  ;;  %v342_v58 = vadd.f32 %v691_v46, %v310_v48  ;;  %v343_v59 = vadd.f32 %v692_v47, %v311_v49 }
  0x24   : > { %v350_v60 = vadd.f32 %v707_v50, %v318_v54  ;;  %v351_v61 = vadd.f32 %v708_v51, %v319_v55 }
  0x26   : > { %628 = vmatmul.msk.bf16.gmra.mxu0 %vm373_vm1, %v353_v62  ;;  %v355_v62 = vpack.c.bf16 %v327_v53, %v326_v52 }
  0x28   : > { %632 = vmatmul.msk.bf16.gmra.mxu1 %vm373_vm1, %v357_v63  ;;  %v359_v63 = vpack.c.bf16 %v335_v57, %v334_v56 }
  0x29   : > { %636 = vmatmul.msk.bf16.gmra.mxu2 %vm373_vm1, %v361_v0  ;;  %v363_v0 = vpack.c.bf16 %v343_v59, %v342_v58 }
  0x2b   : > { %640 = vmatmul.msk.bf16.gmra.mxu3 %vm373_vm1, %v365_v1  ;;  %v367_v1 = vpack.c.bf16 %v351_v61, %v350_v60 }
  0x36   : > { %629 = vmatmul.msk.bf16.gmra.mxu0 %vm373_vm1, %v354_v30 }
  0x38   : > { %633 = vmatmul.msk.bf16.gmra.mxu1 %vm373_vm1, %v358_v31 }
  0x39   : > { %637 = vmatmul.msk.bf16.gmra.mxu2 %vm373_vm1, %v362_v32 }
  0x3b   : > { %641 = vmatmul.msk.bf16.gmra.mxu3 %vm373_vm1, %v366_v33 }
  0x46   : > { %630 = vmatmul.msk.bf16.gmra.mxu0 %vm373_vm1, %v355_v62 }
  0x48   : > { %634 = vmatmul.msk.bf16.gmra.mxu1 %vm373_vm1, %v359_v63 }
  0x49   : > { %638 = vmatmul.msk.bf16.gmra.mxu2 %vm373_vm1, %v363_v0 }
  0x4b   : > { %642 = vmatmul.msk.bf16.gmra.mxu3 %vm373_vm1, %v367_v1 }
  0x93   : > { %v435_v3 = vpop.f32.mrf.mxu0 }
  0x94   : > { %v436_v4 = vadd.f32 %v863_v2, %v435_v3 }
  0x95   : > { %v455_v5 = vpop.f32.mrf.mxu1 }
  0x96   : > { %v456_v6 = vadd.f32 %v863_v2, %v455_v5  ;;  %516 = vst.msk [vmem:[%s870_s6] sm:$0xff] %vm515_vm2, %v436_v4 }
  0x98   : > { %524 = vst.msk [vmem:[%s870_s6 + $0x40] sm:$0xff] %vm515_vm2, %v456_v6 }
  0x9b   : > { %v437_v8 = vpop.f32.mrf.mxu0 }
  0x9c   : > { %v475_v7 = vpop.f32.mrf.mxu2  ;;  %v438_v11 = vadd.f32 %v863_v2, %v437_v8 }
  0x9d   : > { %v476_v9 = vadd.f32 %v863_v2, %v475_v7  ;;  %v457_v12 = vpop.f32.mrf.mxu1 }
  0x9e   : > { %v495_v10 = vpop.f32.mrf.mxu3  ;;  %v458_v14 = vadd.f32 %v863_v2, %v457_v12  ;;  %517 = vst.msk [vmem:[%s870_s6 + $0x8] sm:$0xff] %vm515_vm2, %v438_v11 }
  0x9f   : > { %v496_v13 = vadd.f32 %v863_v2, %v495_v10  ;;  %532 = vst.msk [vmem:[%s870_s6 + $0x80] sm:$0xff] %vm515_vm2, %v476_v9 }
  0xa0   : > { %525 = vst.msk [vmem:[%s870_s6 + $0x48] sm:$0xff] %vm515_vm2, %v458_v14 }
  0xa1   : > { %540 = vst.msk [vmem:[%s870_s6 + $0xc0] sm:$0xff] %vm515_vm2, %v496_v13 }
  0xa3   : > { %v440_v16 = vpop.f32.mrf.mxu0 }
  0xa4   : > { %v477_v15 = vpop.f32.mrf.mxu2  ;;  %v441_v19 = vadd.f32 %v863_v2, %v440_v16 }
  0xa5   : > { %v478_v17 = vadd.f32 %v863_v2, %v477_v15  ;;  %v460_v20 = vpop.f32.mrf.mxu1 }
  0xa6   : > { %v497_v18 = vpop.f32.mrf.mxu3  ;;  %v461_v22 = vadd.f32 %v863_v2, %v460_v20  ;;  %518 = vst.msk [vmem:[%s870_s6 + $0x10] sm:$0xff] %vm515_vm2, %v441_v19 }
  0xa7   : > { %v498_v21 = vadd.f32 %v863_v2, %v497_v18  ;;  %533 = vst.msk [vmem:[%s870_s6 + $0x88] sm:$0xff] %vm515_vm2, %v478_v17 }
  0xa8   : > { %526 = vst.msk [vmem:[%s870_s6 + $0x50] sm:$0xff] %vm515_vm2, %v461_v22 }
  0xa9   : > { %541 = vst.msk [vmem:[%s870_s6 + $0xc8] sm:$0xff] %vm515_vm2, %v498_v21 }
  0xab   : > { %v442_v24 = vpop.f32.mrf.mxu0 }
  0xac   : > { %v480_v23 = vpop.f32.mrf.mxu2  ;;  %v443_v27 = vadd.f32 %v863_v2, %v442_v24 }
  0xad   : > { %v481_v25 = vadd.f32 %v863_v2, %v480_v23  ;;  %v462_v28 = vpop.f32.mrf.mxu1 }
  0xae   : > { %v500_v26 = vpop.f32.mrf.mxu3  ;;  %v463_v30 = vadd.f32 %v863_v2, %v462_v28  ;;  %519 = vst.msk [vmem:[%s870_s6 + $0x18] sm:$0xff] %vm515_vm2, %v443_v27 }
  0xaf   : > { %v501_v29 = vadd.f32 %v863_v2, %v500_v26  ;;  %534 = vst.msk [vmem:[%s870_s6 + $0x90] sm:$0xff] %vm515_vm2, %v481_v25 }
  0xb0   : > { %527 = vst.msk [vmem:[%s870_s6 + $0x58] sm:$0xff] %vm515_vm2, %v463_v30 }
  0xb1   : > { %542 = vst.msk [vmem:[%s870_s6 + $0xd0] sm:$0xff] %vm515_vm2, %v501_v29 }
  0xb3   : > { %v445_v32 = vpop.f32.mrf.mxu0 }
  0xb4   : > { %v482_v31 = vpop.f32.mrf.mxu2  ;;  %v446_v35 = vadd.f32 %v863_v2, %v445_v32 }
  0xb5   : > { %v483_v33 = vadd.f32 %v863_v2, %v482_v31  ;;  %v465_v36 = vpop.f32.mrf.mxu1 }
  0xb6   : > { %v502_v34 = vpop.f32.mrf.mxu3  ;;  %v466_v38 = vadd.f32 %v863_v2, %v465_v36  ;;  %520 = vst.msk [vmem:[%s870_s6 + $0x20] sm:$0xff] %vm515_vm2, %v446_v35 }
  0xb7   : > { %v503_v37 = vadd.f32 %v863_v2, %v502_v34  ;;  %535 = vst.msk [vmem:[%s870_s6 + $0x98] sm:$0xff] %vm515_vm2, %v483_v33 }
  0xb8   : > { %528 = vst.msk [vmem:[%s870_s6 + $0x60] sm:$0xff] %vm515_vm2, %v466_v38 }
  0xb9   : > { %543 = vst.msk [vmem:[%s870_s6 + $0xd8] sm:$0xff] %vm515_vm2, %v503_v37 }
  0xbb   : > { %v447_v40 = vpop.f32.mrf.mxu0 }
  0xbc   : > { %v485_v39 = vpop.f32.mrf.mxu2  ;;  %v448_v43 = vadd.f32 %v863_v2, %v447_v40 }
  0xbd   : > { %v486_v41 = vadd.f32 %v863_v2, %v485_v39  ;;  %v467_v44 = vpop.f32.mrf.mxu1 }
  0xbe   : > { %v505_v42 = vpop.f32.mrf.mxu3  ;;  %v468_v46 = vadd.f32 %v863_v2, %v467_v44  ;;  %521 = vst.msk [vmem:[%s870_s6 + $0x28] sm:$0xff] %vm515_vm2, %v448_v43 }
  0xbf   : > { %v506_v45 = vadd.f32 %v863_v2, %v505_v42  ;;  %536 = vst.msk [vmem:[%s870_s6 + $0xa0] sm:$0xff] %vm515_vm2, %v486_v41 }
  0xc0   : > { %529 = vst.msk [vmem:[%s870_s6 + $0x68] sm:$0xff] %vm515_vm2, %v468_v46 }
  0xc1   : > { %544 = vst.msk [vmem:[%s870_s6 + $0xe0] sm:$0xff] %vm515_vm2, %v506_v45 }
  0xc3   : > { %v450_v48 = vpop.f32.mrf.mxu0 }
  0xc4   : > { %v487_v47 = vpop.f32.mrf.mxu2  ;;  %v451_v51 = vadd.f32 %v863_v2, %v450_v48 }
  0xc5   : > { %v488_v49 = vadd.f32 %v863_v2, %v487_v47  ;;  %v470_v52 = vpop.f32.mrf.mxu1 }
  0xc6   : > { %v507_v50 = vpop.f32.mrf.mxu3  ;;  %v471_v54 = vadd.f32 %v863_v2, %v470_v52  ;;  %522 = vst.msk [vmem:[%s870_s6 + $0x30] sm:$0xff] %vm515_vm2, %v451_v51 }
  0xc7   : > { %v508_v53 = vadd.f32 %v863_v2, %v507_v50  ;;  %537 = vst.msk [vmem:[%s870_s6 + $0xa8] sm:$0xff] %vm515_vm2, %v488_v49 }
  0xc8   : > { %530 = vst.msk [vmem:[%s870_s6 + $0x70] sm:$0xff] %vm515_vm2, %v471_v54 }
  0xc9   : > { %545 = vst.msk [vmem:[%s870_s6 + $0xe8] sm:$0xff] %vm515_vm2, %v508_v53 }
  0xcb   : > { %v452_v56 = vpop.f32.mrf.mxu0 }
  0xcc   : > { %v490_v55 = vpop.f32.mrf.mxu2  ;;  %v453_v59 = vadd.f32 %v863_v2, %v452_v56 }
  0xcd   : > { %v491_v57 = vadd.f32 %v863_v2, %v490_v55  ;;  %v472_v60 = vpop.f32.mrf.mxu1 }
  0xce   : > { %v510_v58 = vpop.f32.mrf.mxu3  ;;  %v473_v62 = vadd.f32 %v863_v2, %v472_v60  ;;  %523 = vst.msk [vmem:[%s870_s6 + $0x38] sm:$0xff] %vm515_vm2, %v453_v59 }
  0xcf   : > { %v511_v61 = vadd.f32 %v863_v2, %v510_v58  ;;  %538 = vst.msk [vmem:[%s870_s6 + $0xb0] sm:$0xff] %vm515_vm2, %v491_v57 }
  0xd0   : > { %531 = vst.msk [vmem:[%s870_s6 + $0x78] sm:$0xff] %vm515_vm2, %v473_v62 }
  0xd1   : > { %546 = vst.msk [vmem:[%s870_s6 + $0xf0] sm:$0xff] %vm515_vm2, %v511_v61 }
  0xd4   : > { %v492_v63 = vpop.f32.mrf.mxu2 }
  0xd5   : > { %v493_v0 = vadd.f32 %v863_v2, %v492_v63 }
  0xd6   : > { %v512_v1 = vpop.f32.mrf.mxu3 }
  0xd7   : > { %v513_v3 = vadd.f32 %v863_v2, %v512_v1  ;;  %539 = vst.msk [vmem:[%s870_s6 + $0xb8] sm:$0xff] %vm515_vm2, %v493_v0 }
  0xd9   : > { %547 = vst.msk [vmem:[%s870_s6 + $0xf8] sm:$0xff] %vm515_vm2, %v513_v3 }
  0xda PF: > { %s14_s15 = sadd.s32 1, %s742_s15  }
  0xdb   : > { %p11_p4 = scmp.ge.s32.totalorder %s14_s15, 4  }
  0xdd   :  { %13 = sbr.rel (!%p11_p4) target bundleno = 1 (0x1), region = 69 }

</bundles_post_ra>
